<compile_context>
chip_gen: v7x
topology: tpu7x:2x2x1
jax: 0.10.0
libtpu: 0.0.40
codegen_flags: <defaults>
</compile_context>

<pallas_src>
import functools

import jax
import jax.numpy as jnp
from jax.experimental import pallas as pl
from jax.experimental.pallas import tpu as pltpu

_LANE = 128
_SUBLANE = 8


def _round_up(n, m):
    return ((n + m - 1) // m) * m


def _orthogonal(key, rows, cols, gain=1.0, dtype=jnp.float32):
    """Deterministic orthogonal init (same spirit as nn.init.orthogonal_)."""
    n = max(rows, cols)
    a = jax.random.normal(key, (n, n), dtype=jnp.float32)
    q, r = jnp.linalg.qr(a)
    d = jnp.sign(jnp.diagonal(r))  # sign fix for uniqueness, like torch
    q = q * d[None, :]
    return (gain * q[:rows, :cols]).astype(dtype)


def init_mlp_params(key, input_dim, output_dim, hidden_dim, hidden_depth):
    """Matches mlp(...) + weight_init: orthogonal weights, zero biases.

    Returns a list of (W, b) with W of shape [in, out] (transposed vs torch).
    """
    if hidden_depth == 0:
        dims = [(input_dim, output_dim)]
    else:
        dims = [(input_dim, hidden_dim)]
        dims += [(hidden_dim, hidden_dim)] * (hidden_depth - 1)
        dims += [(hidden_dim, output_dim)]
    params = []
    keys = jax.random.split(key, len(dims))
    for k, (din, dout) in zip(keys, dims):
        w_torch = _orthogonal(k, dout, din)          # [out, in] like nn.Linear.weight
        w = jnp.transpose(w_torch)                   # [in, out]
        b = jnp.zeros((1, dout), dtype=jnp.float32)  # [1, out]
        params.append((w, b))
    return params


# ----------------------------------------------------------------------------
# Kernel
# ----------------------------------------------------------------------------
def _mlp_kernel(*refs, n_layers, use_tanh):
    # refs = (x_ref, w0, b0, w1, b1, ..., o_ref)
    x_ref = refs[0]
    o_ref = refs[-1]
    h = x_ref[...].astype(jnp.float32)
    for layer in range(n_layers):
        w_ref = refs[1 + 2 * layer]
        b_ref = refs[2 + 2 * layer]
        # bf16 operands on the MXU, f32 accumulation; elementwise tail in f32.
        h = jnp.dot(h.astype(jnp.bfloat16), w_ref[...],
                    preferred_element_type=jnp.float32)
        h = h + b_ref[...]
        if layer < n_layers - 1:
            h = jnp.maximum(h, 0.0)  # ReLU on all but the final Linear
    if use_tanh:
        h = jnp.tanh(h)
    o_ref[...] = h.astype(o_ref.dtype)


# ----------------------------------------------------------------------------
# Wrapper
# ----------------------------------------------------------------------------
def _pad_params(params):
    """Zero-pad every weight/bias to lane-dense (multiple of 128) feature dims.

    Weights are stored bf16 (MXU operand dtype, halves DMA/VMEM); biases stay
    f32.  Zero padding keeps semantics: padded lanes stay exactly zero through
    bias-add / ReLU / tanh and are sliced away at the end.
    """
    padded = []
    for w, b in params:
        din, dout = w.shape
        din_p, dout_p = _round_up(din, _LANE), _round_up(dout, _LANE)
        w_p = jnp.zeros((din_p, dout_p), jnp.bfloat16)
        w_p = w_p.at[:din, :dout].set(w.astype(jnp.bfloat16))
        b_p = jnp.zeros((1, dout_p), jnp.float32)
        b_p = b_p.at[:, :dout].set(b.astype(jnp.float32))
        padded.append((w_p, b_p))
    return padded


def _estimate_vmem(tb, in_p, out_p, padded_params, weight_buffers):
    act = 2 * tb * in_p * 4 + 2 * tb * out_p * 4          # double-buffered x / out
    wts = weight_buffers * sum(
        w.size * w.dtype.itemsize + b.size * b.dtype.itemsize
        for w, b in padded_params)
    max_dim = max([in_p, out_p] + [w.shape[1] for w, _ in padded_params])
    interm = 3 * tb * max_dim * 4                          # live f32 intermediates
    return act + wts + interm


def _choose_tb(batch, in_p, out_p, padded_params):
    tb = 256 if batch >= 256 else _round_up(batch, _SUBLANE)
    # Keep the single-buffered-weight footprint v7x-safe (~40 MiB of 64 MiB).
    while tb > _SUBLANE and _estimate_vmem(tb, in_p, out_p, padded_params, 1) > 40 * 1024 * 1024:
        tb //= 2
    return _round_up(max(tb, _SUBLANE), _SUBLANE)


def mlp_forward(x, params, output_mod=None):
    """Fused MLP forward using a single pallas_call tiled over the batch.

    x:      [batch, input_dim] float32
    params: list of (W [in,out], b [1,out]) as returned by init_mlp_params
    """
    assert output_mod in (None, "tanh")
    n_layers = len(params)
    batch, in_dim = x.shape
    out_dim = params[-1][0].shape[1]

    padded_params = _pad_params(params)
    in_p = padded_params[0][0].shape[0]
    out_p = padded_params[-1][0].shape[1]

    tb = _choose_tb(batch, in_p, out_p, padded_params)
    batch_p = _round_up(batch, tb)
    num_blocks = batch_p // tb

    x_p = jnp.zeros((batch_p, in_p), jnp.float32)
    x_p = x_p.at[:batch, :in_dim].set(x.astype(jnp.float32))

    flat_args = [x_p]
    for (w, b) in padded_params:
        flat_args += [w, b]

    kernel = functools.partial(
        _mlp_kernel, n_layers=n_layers, use_tanh=(output_mod == "tanh"))

    vmem_limit = int(min(
        max(int(1.5 * _estimate_vmem(tb, in_p, out_p, padded_params, 2)),
            16 * 1024 * 1024),
        48 * 1024 * 1024))  # v7x-safe ceiling; toy shapes clamp to the 16 MiB floor

    def build_call(single_buffer_weights):
        in_specs = [pl.BlockSpec((tb, in_p), lambda i: (i, 0))]
        for (w, b) in padded_params:
            if single_buffer_weights:
                # Weights/biases never change across grid steps -> single buffer.
                in_specs += [
                    pl.BlockSpec(w.shape, lambda i: (0, 0),
                                 pipeline_mode=pl.Buffered(1)),
                    pl.BlockSpec(b.shape, lambda i: (0, 0),
                                 pipeline_mode=pl.Buffered(1)),
                ]
            else:
                in_specs += [
                    pl.BlockSpec(w.shape, lambda i: (0, 0)),
                    pl.BlockSpec(b.shape, lambda i: (0, 0)),
                ]
        return pl.pallas_call(
            kernel,
            out_shape=jax.ShapeDtypeStruct((batch_p, out_p), jnp.float32),
            grid=(num_blocks,),
            in_specs=in_specs,
            out_specs=pl.BlockSpec((tb, out_p), lambda i: (i, 0)),
            compiler_params=pltpu.CompilerParams(
                dimension_semantics=("parallel",),
                vmem_limit_bytes=vmem_limit),
        )

    try:
        y_p = jax.block_until_ready(build_call(True)(*flat_args))
    except Exception:
        # Fallback if single-buffered pipeline_mode is rejected on this jax
        # version: default (double-buffered) weight specs, otherwise identical.
        y_p = jax.block_until_ready(build_call(False)(*flat_args))

    return y_p[:batch, :out_dim]


def mlp_reference(x, params, output_mod=None):
    h = x
    for i, (w, b) in enumerate(params):
        h = h @ w + b
        if i < len(params) - 1:
            h = jnp.maximum(h, 0.0)
    if output_mod == "tanh":
        h = jnp.tanh(h)
    return h


if __name__ == "__main__":
    # Shapes consistent with the module's forward:
    # MLP(input_dim=16, output_dim=8, hidden_dim=32, hidden_depth=2)
    # batch=384 exercises the multi-block batch grid (TB=256 -> 2 grid steps)
    # while staying tiny.  For real workloads, fold extra leading dims into
    # the batch before calling (tiny per-call batches are pure launch overhead).
    batch, input_dim, hidden_dim, output_dim, hidden_depth = 384, 16, 32, 8, 2

    key = jax.random.PRNGKey(0)
    k_param, k_x = jax.random.split(key)

    params = init_mlp_params(k_param, input_dim, output_dim, hidden_dim, hidden_depth)
    x = jax.random.normal(k_x, (batch, input_dim), dtype=jnp.float32)

    # Plain trunk (output_mod=None)
    y = mlp_forward(x, params, output_mod=None)
    y = jax.block_until_ready(y)
    y_ref = mlp_reference(x, params, output_mod=None)
    assert y.shape == (batch, output_dim)
    # bf16 MXU operands -> loosened tolerance vs the f32 reference.
    assert jnp.allclose(y, y_ref, atol=5e-2, rtol=5e-2)

    # tanh output head
    y_t = jax.block_until_ready(mlp_forward(x, params, output_mod="tanh"))
    y_t_ref = mlp_reference(x, params, output_mod="tanh")
    assert y_t.shape == (batch, output_dim)
    assert jnp.allclose(y_t, y_t_ref, atol=5e-2, rtol=5e-2)

    print("KERNEL_OK")
</pallas_src>

<mosaic_0001>
module attributes {stable_mosaic.version = 11 : i64} {
  func.func @_mlp_kernel(%arg0: i32, %arg1: memref<256x128xf32, #tpu.memory_space<vmem>>, %arg2: memref<128x128xbf16, #tpu.memory_space<vmem>>, %arg3: memref<1x128xf32, #tpu.memory_space<vmem>>, %arg4: memref<128x128xbf16, #tpu.memory_space<vmem>>, %arg5: memref<1x128xf32, #tpu.memory_space<vmem>>, %arg6: memref<128x128xbf16, #tpu.memory_space<vmem>>, %arg7: memref<1x128xf32, #tpu.memory_space<vmem>>, %arg8: memref<256x128xf32, #tpu.memory_space<vmem>>) attributes {dimension_semantics = [#tpu.dimension_semantics<parallel>], iteration_bounds = array<i64: 2>, scalar_prefetch = 0 : i64, scratch_operands = 0 : i64, tpu.core_type = #tpu.core_type<tc>, window_params = [{transform_indices = @transform_0, window_bounds = array<i64: 256, 128>}, {pipeline_mode = #tpu.pipeline_mode<synchronous>, transform_indices = @transform_1, window_bounds = array<i64: 128, 128>}, {pipeline_mode = #tpu.pipeline_mode<synchronous>, transform_indices = @transform_2, window_bounds = array<i64: 1, 128>}, {pipeline_mode = #tpu.pipeline_mode<synchronous>, transform_indices = @transform_3, window_bounds = array<i64: 128, 128>}, {pipeline_mode = #tpu.pipeline_mode<synchronous>, transform_indices = @transform_4, window_bounds = array<i64: 1, 128>}, {pipeline_mode = #tpu.pipeline_mode<synchronous>, transform_indices = @transform_5, window_bounds = array<i64: 128, 128>}, {pipeline_mode = #tpu.pipeline_mode<synchronous>, transform_indices = @transform_6, window_bounds = array<i64: 1, 128>}, {transform_indices = @transform_7, window_bounds = array<i64: 256, 128>}]} {
    %c0 = arith.constant 0 : index
    %c0_0 = arith.constant 0 : index
    %0 = vector.load %arg1[%c0, %c0_0] : memref<256x128xf32, #tpu.memory_space<vmem>>, vector<256x128xf32>
    %1 = arith.truncf %0 : vector<256x128xf32> to vector<256x128xbf16>
    %c0_1 = arith.constant 0 : index
    %c0_2 = arith.constant 0 : index
    %2 = vector.load %arg2[%c0_1, %c0_2] : memref<128x128xbf16, #tpu.memory_space<vmem>>, vector<128x128xbf16>
    %cst = arith.constant dense<0.000000e+00> : vector<256x128xf32>
    %3 = tpu.matmul %1, %2, %cst {dimension_numbers = #tpu.dot_dimension_numbers<[1], [0], [0], [1], [0, 0, 1, 1], [], []>} : vector<256x128xbf16>, vector<128x128xbf16>, vector<256x128xf32> -> vector<256x128xf32>
    %c0_3 = arith.constant 0 : index
    %c0_4 = arith.constant 0 : index
    %4 = vector.load %arg3[%c0_3, %c0_4] : memref<1x128xf32, #tpu.memory_space<vmem>>, vector<1x128xf32>
    %5 = vector.broadcast %4 : vector<1x128xf32> to vector<256x128xf32>
    %6 = arith.addf %3, %5 : vector<256x128xf32>
    %cst_5 = arith.constant 0.000000e+00 : f32
    %7 = vector.broadcast %cst_5 : f32 to vector<256x128xf32>
    %8 = arith.maximumf %6, %7 : vector<256x128xf32>
    %9 = arith.truncf %8 : vector<256x128xf32> to vector<256x128xbf16>
    %c0_6 = arith.constant 0 : index
    %c0_7 = arith.constant 0 : index
    %10 = vector.load %arg4[%c0_6, %c0_7] : memref<128x128xbf16, #tpu.memory_space<vmem>>, vector<128x128xbf16>
    %cst_8 = arith.constant dense<0.000000e+00> : vector<256x128xf32>
    %11 = tpu.matmul %9, %10, %cst_8 {dimension_numbers = #tpu.dot_dimension_numbers<[1], [0], [0], [1], [0, 0, 1, 1], [], []>} : vector<256x128xbf16>, vector<128x128xbf16>, vector<256x128xf32> -> vector<256x128xf32>
    %c0_9 = arith.constant 0 : index
    %c0_10 = arith.constant 0 : index
    %12 = vector.load %arg5[%c0_9, %c0_10] : memref<1x128xf32, #tpu.memory_space<vmem>>, vector<1x128xf32>
    %13 = vector.broadcast %12 : vector<1x128xf32> to vector<256x128xf32>
    %14 = arith.addf %11, %13 : vector<256x128xf32>
    %cst_11 = arith.constant 0.000000e+00 : f32
    %15 = vector.broadcast %cst_11 : f32 to vector<256x128xf32>
    %16 = arith.maximumf %14, %15 : vector<256x128xf32>
    %17 = arith.truncf %16 : vector<256x128xf32> to vector<256x128xbf16>
    %c0_12 = arith.constant 0 : index
    %c0_13 = arith.constant 0 : index
    %18 = vector.load %arg6[%c0_12, %c0_13] : memref<128x128xbf16, #tpu.memory_space<vmem>>, vector<128x128xbf16>
    %cst_14 = arith.constant dense<0.000000e+00> : vector<256x128xf32>
    %19 = tpu.matmul %17, %18, %cst_14 {dimension_numbers = #tpu.dot_dimension_numbers<[1], [0], [0], [1], [0, 0, 1, 1], [], []>} : vector<256x128xbf16>, vector<128x128xbf16>, vector<256x128xf32> -> vector<256x128xf32>
    %c0_15 = arith.constant 0 : index
    %c0_16 = arith.constant 0 : index
    %20 = vector.load %arg7[%c0_15, %c0_16] : memref<1x128xf32, #tpu.memory_space<vmem>>, vector<1x128xf32>
    %21 = vector.broadcast %20 : vector<1x128xf32> to vector<256x128xf32>
    %22 = arith.addf %19, %21 : vector<256x128xf32>
    %c0_17 = arith.constant 0 : index
    %c0_18 = arith.constant 0 : index
    %23 = vector.load %arg8[%c0_17, %c0_18] : memref<256x128xf32, #tpu.memory_space<vmem>>, vector<256x128xf32>
    tpu.vector_store %arg8[%c0_17, %c0_18], %22 {strides = array<i32>} : memref<256x128xf32, #tpu.memory_space<vmem>>, vector<256x128xf32>,
    return
  }
  func.func @transform_0(%arg0: i32) -> (i32, i32) {
    %c0_i32 = arith.constant 0 : i32
    %c0_i32_0 = arith.constant 0 : i32
    return %arg0, %c0_i32 : i32, i32
  }
  func.func @transform_1(%arg0: i32) -> (i32, i32) {
    %c0_i32 = arith.constant 0 : i32
    %c0_i32_0 = arith.constant 0 : i32
    %c0_i32_1 = arith.constant 0 : i32
    return %c0_i32, %c0_i32_0 : i32, i32
  }
  func.func @transform_2(%arg0: i32) -> (i32, i32) {
    %c0_i32 = arith.constant 0 : i32
    %c0_i32_0 = arith.constant 0 : i32
    %c0_i32_1 = arith.constant 0 : i32
    return %c0_i32, %c0_i32_0 : i32, i32
  }
  func.func @transform_3(%arg0: i32) -> (i32, i32) {
    %c0_i32 = arith.constant 0 : i32
    %c0_i32_0 = arith.constant 0 : i32
    %c0_i32_1 = arith.constant 0 : i32
    return %c0_i32, %c0_i32_0 : i32, i32
  }
  func.func @transform_4(%arg0: i32) -> (i32, i32) {
    %c0_i32 = arith.constant 0 : i32
    %c0_i32_0 = arith.constant 0 : i32
    %c0_i32_1 = arith.constant 0 : i32
    return %c0_i32, %c0_i32_0 : i32, i32
  }
  func.func @transform_5(%arg0: i32) -> (i32, i32) {
    %c0_i32 = arith.constant 0 : i32
    %c0_i32_0 = arith.constant 0 : i32
    %c0_i32_1 = arith.constant 0 : i32
    return %c0_i32, %c0_i32_0 : i32, i32
  }
  func.func @transform_6(%arg0: i32) -> (i32, i32) {
    %c0_i32 = arith.constant 0 : i32
    %c0_i32_0 = arith.constant 0 : i32
    %c0_i32_1 = arith.constant 0 : i32
    return %c0_i32, %c0_i32_0 : i32, i32
  }
  func.func @transform_7(%arg0: i32) -> (i32, i32) {
    %c0_i32 = arith.constant 0 : i32
    %c0_i32_0 = arith.constant 0 : i32
    return %arg0, %c0_i32 : i32, i32
  }
}

module attributes {stable_mosaic.version = 11 : i64} {
  func.func @_mlp_kernel(%arg0: i32, %arg1: memref<256x128xf32, #tpu.memory_space<vmem>>, %arg2: memref<128x128xbf16, #tpu.memory_space<vmem>>, %arg3: memref<1x128xf32, #tpu.memory_space<vmem>>, %arg4: memref<128x128xbf16, #tpu.memory_space<vmem>>, %arg5: memref<1x128xf32, #tpu.memory_space<vmem>>, %arg6: memref<128x128xbf16, #tpu.memory_space<vmem>>, %arg7: memref<1x128xf32, #tpu.memory_space<vmem>>, %arg8: memref<256x128xf32, #tpu.memory_space<vmem>>) attributes {dimension_semantics = [#tpu.dimension_semantics<parallel>], iteration_bounds = array<i64: 2>, scalar_prefetch = 0 : i64, scratch_operands = 0 : i64, tpu.core_type = #tpu.core_type<tc>, window_params = [{transform_indices = @transform_0, window_bounds = array<i64: 256, 128>}, {pipeline_mode = #tpu.pipeline_mode<synchronous>, transform_indices = @transform_1, window_bounds = array<i64: 128, 128>}, {pipeline_mode = #tpu.pipeline_mode<synchronous>, transform_indices = @transform_2, window_bounds = array<i64: 1, 128>}, {pipeline_mode = #tpu.pipeline_mode<synchronous>, transform_indices = @transform_3, window_bounds = array<i64: 128, 128>}, {pipeline_mode = #tpu.pipeline_mode<synchronous>, transform_indices = @transform_4, window_bounds = array<i64: 1, 128>}, {pipeline_mode = #tpu.pipeline_mode<synchronous>, transform_indices = @transform_5, window_bounds = array<i64: 128, 128>}, {pipeline_mode = #tpu.pipeline_mode<synchronous>, transform_indices = @transform_6, window_bounds = array<i64: 1, 128>}, {transform_indices = @transform_7, window_bounds = array<i64: 256, 128>}]} {
    %c0 = arith.constant 0 : index
    %c0_0 = arith.constant 0 : index
    %0 = vector.load %arg1[%c0, %c0_0] : memref<256x128xf32, #tpu.memory_space<vmem>>, vector<256x128xf32>
    %1 = arith.truncf %0 : vector<256x128xf32> to vector<256x128xbf16>
    %c0_1 = arith.constant 0 : index
    %c0_2 = arith.constant 0 : index
    %2 = vector.load %arg2[%c0_1, %c0_2] : memref<128x128xbf16, #tpu.memory_space<vmem>>, vector<128x128xbf16>
    %cst = arith.constant dense<0.000000e+00> : vector<256x128xf32>
    %3 = tpu.matmul %1, %2, %cst {dimension_numbers = #tpu.dot_dimension_numbers<[1], [0], [0], [1], [0, 0, 1, 1], [], []>} : vector<256x128xbf16>, vector<128x128xbf16>, vector<256x128xf32> -> vector<256x128xf32>
    %c0_3 = arith.constant 0 : index
    %c0_4 = arith.constant 0 : index
    %4 = vector.load %arg3[%c0_3, %c0_4] : memref<1x128xf32, #tpu.memory_space<vmem>>, vector<1x128xf32>
    %5 = vector.broadcast %4 : vector<1x128xf32> to vector<256x128xf32>
    %6 = arith.addf %3, %5 : vector<256x128xf32>
    %cst_5 = arith.constant 0.000000e+00 : f32
    %7 = vector.broadcast %cst_5 : f32 to vector<256x128xf32>
    %8 = arith.maximumf %6, %7 : vector<256x128xf32>
    %9 = arith.truncf %8 : vector<256x128xf32> to vector<256x128xbf16>
    %c0_6 = arith.constant 0 : index
    %c0_7 = arith.constant 0 : index
    %10 = vector.load %arg4[%c0_6, %c0_7] : memref<128x128xbf16, #tpu.memory_space<vmem>>, vector<128x128xbf16>
    %cst_8 = arith.constant dense<0.000000e+00> : vector<256x128xf32>
    %11 = tpu.matmul %9, %10, %cst_8 {dimension_numbers = #tpu.dot_dimension_numbers<[1], [0], [0], [1], [0, 0, 1, 1], [], []>} : vector<256x128xbf16>, vector<128x128xbf16>, vector<256x128xf32> -> vector<256x128xf32>
    %c0_9 = arith.constant 0 : index
    %c0_10 = arith.constant 0 : index
    %12 = vector.load %arg5[%c0_9, %c0_10] : memref<1x128xf32, #tpu.memory_space<vmem>>, vector<1x128xf32>
    %13 = vector.broadcast %12 : vector<1x128xf32> to vector<256x128xf32>
    %14 = arith.addf %11, %13 : vector<256x128xf32>
    %cst_11 = arith.constant 0.000000e+00 : f32
    %15 = vector.broadcast %cst_11 : f32 to vector<256x128xf32>
    %16 = arith.maximumf %14, %15 : vector<256x128xf32>
    %17 = arith.truncf %16 : vector<256x128xf32> to vector<256x128xbf16>
    %c0_12 = arith.constant 0 : index
    %c0_13 = arith.constant 0 : index
    %18 = vector.load %arg6[%c0_12, %c0_13] : memref<128x128xbf16, #tpu.memory_space<vmem>>, vector<128x128xbf16>
    %cst_14 = arith.constant dense<0.000000e+00> : vector<256x128xf32>
    %19 = tpu.matmul %17, %18, %cst_14 {dimension_numbers = #tpu.dot_dimension_numbers<[1], [0], [0], [1], [0, 0, 1, 1], [], []>} : vector<256x128xbf16>, vector<128x128xbf16>, vector<256x128xf32> -> vector<256x128xf32>
    %c0_15 = arith.constant 0 : index
    %c0_16 = arith.constant 0 : index
    %20 = vector.load %arg7[%c0_15, %c0_16] : memref<1x128xf32, #tpu.memory_space<vmem>>, vector<1x128xf32>
    %21 = vector.broadcast %20 : vector<1x128xf32> to vector<256x128xf32>
    %22 = arith.addf %19, %21 : vector<256x128xf32>
    %c0_17 = arith.constant 0 : index
    %c0_18 = arith.constant 0 : index
    %23 = vector.load %arg8[%c0_17, %c0_18] : memref<256x128xf32, #tpu.memory_space<vmem>>, vector<256x128xf32>
    tpu.vector_store %arg8[%c0_17, %c0_18], %22 {strides = array<i32>} : memref<256x128xf32, #tpu.memory_space<vmem>>, vector<256x128xf32>,
    return
  }
  func.func @transform_0(%arg0: i32) -> (i32, i32) {
    %c0_i32 = arith.constant 0 : i32
    %c0_i32_0 = arith.constant 0 : i32
    return %arg0, %c0_i32 : i32, i32
  }
  func.func @transform_1(%arg0: i32) -> (i32, i32) {
    %c0_i32 = arith.constant 0 : i32
    %c0_i32_0 = arith.constant 0 : i32
    %c0_i32_1 = arith.constant 0 : i32
    return %c0_i32, %c0_i32_0 : i32, i32
  }
  func.func @transform_2(%arg0: i32) -> (i32, i32) {
    %c0_i32 = arith.constant 0 : i32
    %c0_i32_0 = arith.constant 0 : i32
    %c0_i32_1 = arith.constant 0 : i32
    return %c0_i32, %c0_i32_0 : i32, i32
  }
  func.func @transform_3(%arg0: i32) -> (i32, i32) {
    %c0_i32 = arith.constant 0 : i32
    %c0_i32_0 = arith.constant 0 : i32
    %c0_i32_1 = arith.constant 0 : i32
    return %c0_i32, %c0_i32_0 : i32, i32
  }
  func.func @transform_4(%arg0: i32) -> (i32, i32) {
    %c0_i32 = arith.constant 0 : i32
    %c0_i32_0 = arith.constant 0 : i32
    %c0_i32_1 = arith.constant 0 : i32
    return %c0_i32, %c0_i32_0 : i32, i32
  }
  func.func @transform_5(%arg0: i32) -> (i32, i32) {
    %c0_i32 = arith.constant 0 : i32
    %c0_i32_0 = arith.constant 0 : i32
    %c0_i32_1 = arith.constant 0 : i32
    return %c0_i32, %c0_i32_0 : i32, i32
  }
  func.func @transform_6(%arg0: i32) -> (i32, i32) {
    %c0_i32 = arith.constant 0 : i32
    %c0_i32_0 = arith.constant 0 : i32
    %c0_i32_1 = arith.constant 0 : i32
    return %c0_i32, %c0_i32_0 : i32, i32
  }
  func.func @transform_7(%arg0: i32) -> (i32, i32) {
    %c0_i32 = arith.constant 0 : i32
    %c0_i32_0 = arith.constant 0 : i32
    return %arg0, %c0_i32 : i32, i32
  }
}

</mosaic_0001>

<bundles_post_ra>
// kernel: tpu_custom_call.1
= control target key start
LH: loop header
LB: loop body
LE: loop exit
PB: predicated region body
PF: predicated region fallthrough
CT: control target
= control target key end

     0   :  { %12 = vsyncpa [#allocation3], 0  ;;  %s2422_s0 = inlined_call_operand.hbm [shape: f32[512,128], index: 0, kind: input, shape index: {}]   ;;  %s2423_s1 = inlined_call_operand.hbm [shape: bf16[128,128], index: 1, kind: input, shape index: {}]   ;;  %s2424_s2 = inlined_call_operand.vmem [shape: f32[1,128], index: 2, kind: input, shape index: {}]   ;;  %s2425_s3 = inlined_call_operand.hbm [shape: bf16[128,128], index: 3, kind: input, shape index: {}]   ;;  %s2426_s4 = inlined_call_operand.vmem [shape: f32[1,128], index: 4, kind: input, shape index: {}]   ;;  %s2427_s5 = inlined_call_operand.hbm [shape: bf16[128,128], index: 5, kind: input, shape index: {}]   ;;  %s2428_s6 = inlined_call_operand.vmem [shape: f32[1,128], index: 6, kind: input, shape index: {}]   ;;  %s2429_s7 = inlined_call_operand.hbm [shape: f32[512,128], index: 7, kind: output, shape index: {}]  }
   0x1   :  { %14 = vsyncpa [#allocation3 + $0x1], 0 }
   0x2   :  { %15 = vsyncpa [#allocation6], 0 }
   0x3   :  { %16 = vsyncpa [#allocation9], 0 }
   0x4   :  { %17 = vsyncpa [#allocation4], 0 }
   0x5   :  { %19 = vsyncpa [#allocation4 + $0x1], 0  ;;  %s1961_s24 = smov 0   ;;  %s1963_s25 = smov 0  }
   0x6   :  { %s1965_s26 = smov 0   ;;  %s1967_s27 = smov 0  }
   0x7 LB: > { %s1982_s28 = sadd.s32 4294967295, %s1908_s27   ;;  %s1332_s29 = sadd.s32 4294967294, %s1908_s27   ;;  %s1908_s27 = sphi %s1967_s27, %s2455_s27   ;;  %s1904_s26 = sphi %s1965_s26, %s2454_s26   ;;  %s1900_s25 = sphi %s1963_s25, %s2453_s25   ;;  %s1896_s24 = sphi %s1961_s24, %s2452_s24  }
   0x8   : > { %p45_p0 = scmp.ne.s32.totalorder %s1900_s25, %s1896_s24  ;;  %p2430_p1 = scmp.eq.s32.totalorder %s1982_s28, 0 }
   0x9   : > { %p201_p3 = scmp.eq.s32.totalorder %s1332_s29, 1  ;;  %p1333_p5 = scmp.ge.s32.totalorder %s1908_s27, 1 }
   0xa   : > { %p1991_p4 = por %p2430_p1, %p45_p0  ;;  %p208_p7 = scmp.lt.s32.totalorder %s1908_s27, 3 }
   0xb   : > { %p1996_p6 = por %p201_p3, %p45_p0  ;;  %s1910_s10 = smov [#allocation5]  }
   0xc   : > { %s2434_s30 = scalar_select %p1991_p4, 1, 0 }
   0xd   : > { %s2435_s8 = scalar_select %p1996_p6, 1, 0 }
   0xe   : > { %p2001_p8 = pnand %p1333_p5, %p208_p7  ;;  %s220_s11 = sshll.u32 %s1910_s10, 4  ;;  %s2005_s11 = int_to_ptr.vmem [resolvable:$true] %s220_s11 }
   0xf   : > { %2436 = sst [smem:[#allocation15_spill]] %s2435_s8  ;;  %s1911_s13 = smov [#allocation7]  }
  0x10   : > { %s2437_s9 = scalar_select %p2001_p8, 1, 0 }
  0x11   : > { %p1629_p9 = pneg %p2001_p8  ;;  %s236_s14 = sshll.u32 %s1911_s13, 4  ;;  %s2016_s14 = int_to_ptr.vmem [resolvable:$true] %s236_s14 }
  0x12   : > { %s1912_s15 = smov [#allocation8]   ;;  %s1720_s19 = scalar_lea.hbm %s2423_s1, 1024 }
  0x13   : > { %p2012_p11 = pnand %p1629_p9, %p2430_p1  ;;  %s2018_s16 = sshll.u32 %s1912_s15, 4  ;;  %s253_s16 = int_to_ptr.vmem [resolvable:$true] %s2018_s16 }
  0x14   : > { %p1721_p12 = scmp.ne.s32.totalorder %s2423_s1, %s1720_s19  ;;  %p1727_p5 = scmp.lt.u32.totalorder %s1720_s19, %s2423_s1 }
  0x15   : > { %p2028_p13 = pneg %p2012_p11 }
  0x17   : > { %p1723_p0 = pnand %p2028_p13, %p1721_p12 }
  0x19   : > { %p1724_p3 = pneg %p1723_p0 }
  0x1b   : > { %p1729_p7 = pnand %p1727_p5, %p1724_p3 }
  0x1d   : > { %1732 = shalt.err (!%p1729_p7)
}
  0x1e   : > { %s1733_s10 = scalar_lea.vmem %s2005_s11, 1024  ;;  %p1741_p2 = scmp.lt.s32.totalorder %s2005_s11, %s2005_s11 }
  0x1f   : > { %p1734_p9 = scmp.ne.s32.totalorder %s2005_s11, %s1733_s10  ;;  %p1742_p6 = scmp.lt.s32.totalorder %s1733_s10, %s1733_s10 }
  0x21   : > { %p1736_p10 = pnand %p1734_p9, %p2028_p13  ;;  %p1743_p12 = por %p1742_p6, %p1741_p2 }
  0x23   : > { %p1737_p1 = pneg %p1736_p10 }
  0x25   : > { %p1744_p0 = pnand %p1743_p12, %p1737_p1 }
  0x27   : > { %1747 = shalt.err (!%p1744_p0)
}
  0x28   : > { %s1913_s13 = smov 64   ;;  %s1914_s15 = smov 4  }
  0x29   : > { %1632 = dma.hbm_to_vmem [thread:$0]  (!%p2012_p11), %s2423_s1, 1024, %s2005_s11, [#allocation6], %s1913_s13, %s1913_s13, %s1914_s15  }
  0x2a   : > { %s1748_s21 = scalar_lea.hbm %s2425_s3, 1024 }
  0x2b   : > { %p1749_p1 = scmp.ne.s32.totalorder %s2425_s3, %s1748_s21  ;;  %p1755_p10 = scmp.lt.u32.totalorder %s1748_s21, %s2425_s3 }
  0x2d   : > { %p1751_p2 = pnand %p1749_p1, %p2028_p13 }
  0x2f   : > { %p1752_p6 = pneg %p1751_p2 }
  0x31   : > { %p1757_p3 = pnand %p1755_p10, %p1752_p6 }
  0x33   : > { %1760 = shalt.err (!%p1757_p3)
}
  0x34   : > { %s1761_s11 = scalar_lea.vmem %s2016_s14, 1024  ;;  %p1769_p12 = scmp.lt.s32.totalorder %s2016_s14, %s2016_s14 }
  0x35   : > { %p1762_p5 = scmp.ne.s32.totalorder %s2016_s14, %s1761_s11  ;;  %p1770_p0 = scmp.lt.s32.totalorder %s1761_s11, %s1761_s11 }
  0x37   : > { %p1764_p7 = pnand %p1762_p5, %p2028_p13  ;;  %p1771_p1 = por %p1770_p0, %p1769_p12 }
  0x39   : > { %p1765_p9 = pneg %p1764_p7 }
  0x3b   : > { %p1772_p2 = pnand %p1771_p1, %p1765_p9 }
  0x3d   : > { %1775 = shalt.err (!%p1772_p2)
}
  0x3e   : > { %1635 = dma.hbm_to_vmem [thread:$0]  (!%p2012_p11), %s2425_s3, 1024, %s2016_s14, [#allocation6], %s1913_s13, %s1913_s13, %s1914_s15  }
  0x3f   : > { %s1776_s20 = scalar_lea.hbm %s2427_s5, 1024 }
  0x40   : > { %p1777_p6 = scmp.ne.s32.totalorder %s2427_s5, %s1776_s20  ;;  %p1783_p5 = scmp.lt.u32.totalorder %s1776_s20, %s2427_s5 }
  0x42   : > { %p1779_p10 = pnand %p1777_p6, %p2028_p13 }
  0x44   : > { %p1780_p3 = pneg %p1779_p10 }
  0x46   : > { %p1785_p7 = pnand %p1783_p5, %p1780_p3 }
  0x48   : > { %1788 = shalt.err (!%p1785_p7)
}
  0x49   : > { %s1789_s11 = scalar_lea.vmem %s253_s16, 1024  ;;  %p1797_p1 = scmp.lt.s32.totalorder %s253_s16, %s253_s16 }
  0x4a   : > { %p1790_p9 = scmp.ne.s32.totalorder %s253_s16, %s1789_s11  ;;  %p1798_p2 = scmp.lt.s32.totalorder %s1789_s11, %s1789_s11 }
  0x4c   : > { %p1792_p12 = pnand %p1790_p9, %p2028_p13  ;;  %p1799_p4 = por %p1798_p2, %p1797_p1 }
  0x4e   : > { %p1793_p0 = pneg %p1792_p12 }
  0x50   : > { %p1800_p8 = pnand %p1799_p4, %p1793_p0 }
  0x52   : > { %1803 = shalt.err (!%p1800_p8)
}
  0x53   : > { %1638 = dma.hbm_to_vmem [thread:$0]  (!%p2012_p11), %s2427_s5, 1024, %s253_s16, [#allocation9], %s1913_s13, %s1913_s13, %s1914_s15  }
  0x54   : > { %s2101_s22 = sadd.s32 1, %s1908_s27   ;;  %s32_s17 = sadd.s32 1, %s1904_s26 }
  0x55   : > { %s29_s12 = ssub.s32 %s1908_s27, %s2101_s22  ;;  %p39_p8 = scmp.ne.s32.totalorder %s1904_s26, %s1900_s25 }
  0x56   : > { %p30_p4 = scmp.eq.s32.totalorder %s29_s12, 0  ;;  %p40_p13 = scmp.eq.s32.totalorder %s1908_s27, 0 }
  0x57   : > { %p1650_p6 = scmp.lt.s32.totalorder %s1908_s27, 2  ;;  %p2440_p3 = scmp.eq.s32.totalorder %s1982_s28, 1 }
  0x58   : > { %s2111_s18 = scalar_select %p30_p4, %s1904_s26, %s32_s17  }
  0x59   : > { %p41_p10 = por %p40_p13, %p39_p8  ;;  %p2115_p5 = por %p2440_p3, %p39_p8 }
  0x5a   : > { %s269_s20 = sand.u32 1, %s1904_s26   ;;  %s1379_s21 = sshll.u32 %s1908_s27, 12 }
  0x5b   : > { %s1338_s16 = sshll.u32 %s269_s20, 8  ;;  %s2124_s23 = scalar_lea.hbm %s2422_s0, %s1379_s21 }
  0x5c   : > { %s273_s29 = scalar_lea.vmem [#allocation2], %s1338_s16  ;;  %p2126_p11 = pnand %p1650_p6, %p41_p10 }
  0x5d   : > { %s280_s10 = sshll.u32 %s273_s29, 4  ;;  %s2132_s14 = scalar_lea.sflag [#allocation3], %s269_s20  ;;  %s2130_s10 = int_to_ptr.vmem [resolvable:$true] %s280_s10 }
  0x5e   : > { %s1804_s8 = scalar_lea.hbm %s2124_s23, 4096  ;;  %p1806_p9 = pneg %p2126_p11 }
  0x5f   : > { %p1805_p7 = scmp.ne.s32.totalorder %s2124_s23, %s1804_s8  ;;  %s1809_s21 = scalar_lea.hbm %s2422_s0, 8192 }
  0x60   : > { %p1810_p1 = scmp.lt.u32.totalorder %s2124_s23, %s2422_s0  ;;  %p1811_p2 = scmp.lt.u32.totalorder %s1809_s21, %s1804_s8 }
  0x61   : > { %p1807_p12 = pnand %p1806_p9, %p1805_p7  ;;  %p1813_p8 = scmp.lt.u32.totalorder %s1804_s8, %s2124_s23 }
  0x62   : > { %p1812_p4 = por %p1811_p2, %p1810_p1 }
  0x63   : > { %p1808_p0 = pneg %p1807_p12 }
  0x64   : > { %p1814_p13 = por %p1813_p8, %p1812_p4 }
  0x66   : > { %p1815_p6 = pnand %p1814_p13, %p1808_p0 }
  0x68   : > { %1818 = shalt.err (!%p1815_p6)
}
  0x69   : > { %s1819_s20 = scalar_lea.vmem %s2130_s10, 4096  ;;  %s1915_s15 = smov [#allocation2]  }
  0x6a   : > { %p1820_p10 = scmp.ne.s32.totalorder %s2130_s10, %s1819_s20  ;;  %s1824_s29 = sshll.u32 %s1915_s15, 4  ;;  %s1825_s29 = int_to_ptr.vmem [resolvable:$false] %s1824_s29 }
  0x6b   : > { %s1826_s12 = scalar_lea.vmem %s1825_s29, 8192  ;;  %p1827_p12 = scmp.lt.s32.totalorder %s2130_s10, %s1825_s29 }
  0x6c   : > { %p1822_p3 = pnand %p1820_p10, %p1806_p9  ;;  %p1828_p1 = scmp.lt.s32.totalorder %s1826_s12, %s1819_s20 }
  0x6e   : > { %p1823_p7 = pneg %p1822_p3  ;;  %p1829_p2 = por %p1828_p1, %p1827_p12 }
  0x70   : > { %p1830_p4 = pnand %p1829_p2, %p1823_p7 }
  0x72   : > { %1833 = shalt.err (!%p1830_p4)
}
  0x73   : > { %s1916_s8 = smov 128   ;;  %s1917_s17 = smov 8  }
  0x74   : > { %1642 = dma.hbm_to_vmem [thread:$0]  (!%p2126_p11), %s2124_s23, 4096, %s2130_s10, %s2132_s14, %s1916_s8, %s1916_s8, %s1917_s17  }
  0x75   : > { %p2443_p9 = scmp.ne.s32.totalorder %s2437_s9, 0 }
  0x76   : > { %s2163_s21 = sand.u32 (!%p2443_p9), 1, %s1900_s25   ;;  %p2444_p0 = scmp.ne.s32.totalorder (!%p2443_p9), %s2434_s30, 0 }
  0x77   : > { %292 = sbr.rel (%p2443_p9) target bundleno = 899 (0x383), region = 48  ;;  %s1342_s16 = sshll.u32 (!%p2443_p9), %s2163_s21, 8 }
  0x78   : > { %s295_s13 = scalar_lea.sflag (!%p2443_p9), [#allocation3], %s2163_s21  ;;  %s2169_s20 = scalar_lea.vmem (!%p2443_p9), [#allocation2], %s1342_s16 }
  0x7e   : > { %1879 = dma.done.wait (%p2444_p0), %s295_s13, 4096  }
  0x7f   : > { %1881 = vsyncadd (%p2444_p0), %s295_s13, 4294963200  ;;  %p2445_p11 = scmp.eq.s32.totalorder %s1982_s28, 0 }
  0x81   : > { %1883 = dma.done.wait (%p2445_p11), [#allocation6], 2048   ;;  %p2446_p8 = pmov %p2445_p11 }
  0x83   : > { %1885 = vsyncadd (%p2446_p8), [#allocation6], 4294965248  ;;  %p2447_p13 = pmov %p2446_p8 }
  0x84   : > { %p2448_p6 = pmov %p2446_p8 }
  0x85   : > { %1887 = dma.done.wait (%p2447_p13), [#allocation9], 1024  }
  0x86   : > { %1889 = vsyncadd (%p2448_p6), [#allocation9], 4294966272  ;;  %v1696_v0 = vld [vmem:[#allocation5] sm:$0xff]   ;;  %v1697_v1 = vld [vmem:[#allocation5 + $0x8] sm:$0xff]   ;;  %s2307_s15 = scalar_lea.vmem [#allocation10], %s1342_s16  ;;  %s1380_s29 = sshll.u32 %s1982_s28, 12 }
  0x87   : > { %1453 = vmatprep.subr.bf16.mxu0 %v1696_v0  ;;  %1597 = vmatprep.subr.bf16.mxu1 %v1696_v0  ;;  %v1698_v2 = vld [vmem:[#allocation5 + $0x10] sm:$0xff]   ;;  %v1699_v3 = vld [vmem:[#allocation5 + $0x18] sm:$0xff]   ;;  %v344_v4 = vld [vmem:[%s2169_s20] sm:$0xff]  ;;  %s1230_s12 = sshll.u32 %s2307_s15, 4  ;;  %s2372_s16 = scalar_lea.hbm %s2429_s7, %s1380_s29  ;;  %s2374_s12 = int_to_ptr.vmem [resolvable:$true] %s1230_s12 }
  0x88   : > { %1454 = vmatpush3.bf16.msra.mxu0 %v1696_v0  ;;  %1605 = vmatpush3.bf16.msra.mxu1 %v1696_v0  ;;  %v345_v5 = vld [vmem:[%s2169_s20 + $0x8] sm:$0xff]  ;;  %v1700_v7 = vld [vmem:[#allocation5 + $0x20] sm:$0xff]   ;;  %v1702_v12 = vld [vmem:[#allocation5 + $0x30] sm:$0xff]   ;;  %s1217_s28 = scalar_lea.sflag [#allocation4], %s2163_s21  ;;  %s1834_s13 = scalar_lea.vmem %s2374_s12, 4096 }
  0x89   : > { %1455 = vmatprep.subr.bf16.mxu0 %v1697_v1  ;;  %1598 = vmatprep.subr.bf16.mxu1 %v1697_v1  ;;  %v376_v6 = vpack.c.bf16 %v345_v5, %v344_v4  ;;  %v360_v8 = vld [vmem:[%s2169_s20 + $0x80] sm:$0xff]  ;;  %v361_v9 = vld [vmem:[%s2169_s20 + $0x88] sm:$0xff]  ;;  %v1703_v13 = vld [vmem:[#allocation5 + $0x38] sm:$0xff]   ;;  %p1835_p10 = scmp.ne.s32.totalorder %s2374_s12, %s1834_s13 }
  0x8a   : > { %v384_v10 = vpack.c.bf16 %v361_v9, %v360_v8  ;;  %v1701_v11 = vld [vmem:[#allocation5 + $0x28] sm:$0xff]   ;;  %v346_v14 = vld [vmem:[%s2169_s20 + $0x10] sm:$0xff]  ;;  %v347_v15 = vld [vmem:[%s2169_s20 + $0x18] sm:$0xff] }
  0x8b   : > { %1469 = vmatprep.mubr.bf16.mxu0 %v376_v6  ;;  %v348_v16 = vld [vmem:[%s2169_s20 + $0x20] sm:$0xff]  ;;  %v349_v17 = vld [vmem:[%s2169_s20 + $0x28] sm:$0xff]  ;;  %v362_v18 = vld [vmem:[%s2169_s20 + $0x90] sm:$0xff]  ;;  %v377_v23 = vpack.c.bf16 %v347_v15, %v346_v14  ;;  %p1836_p3 = pnand %p1835_p10, %p2115_p5 }
  0x8c   : > { %1456 = vmatpush3.bf16.msra.mxu0 %v1697_v1  ;;  %1606 = vmatpush3.bf16.msra.mxu1 %v1697_v1  ;;  %v363_v19 = vld [vmem:[%s2169_s20 + $0x98] sm:$0xff]  ;;  %v364_v20 = vld [vmem:[%s2169_s20 + $0xa0] sm:$0xff]  ;;  %v365_v21 = vld [vmem:[%s2169_s20 + $0xa8] sm:$0xff]  ;;  %v378_v24 = vpack.c.bf16 %v349_v17, %v348_v16 }
  0x8d   : > { %1457 = vmatprep.subr.bf16.mxu0 %v1698_v2  ;;  %1599 = vmatprep.subr.bf16.mxu1 %v1698_v2  ;;  %v1704_v22 = vld [vmem:[#allocation7] sm:$0xff]   ;;  %v385_v25 = vpack.c.bf16 %v363_v19, %v362_v18  ;;  %v386_v26 = vpack.c.bf16 %v365_v21, %v364_v20  ;;  %v1705_v27 = vld [vmem:[#allocation7 + $0x8] sm:$0xff]   ;;  %v350_v28 = vld [vmem:[%s2169_s20 + $0x30] sm:$0xff]  ;;  %p1837_p7 = pneg %p1836_p3 }
  0x8e   : > { %1485 = vmatprep.mubr.bf16.mxu1 %v384_v10  ;;  %v351_v29 = vld [vmem:[%s2169_s20 + $0x38] sm:$0xff]  ;;  %v352_v30 = vld [vmem:[%s2169_s20 + $0x40] sm:$0xff]  ;;  %v353_v31 = vld [vmem:[%s2169_s20 + $0x48] sm:$0xff] }
  0x8f   : > { %v366_v32 = vld [vmem:[%s2169_s20 + $0xb0] sm:$0xff]  ;;  %v367_v33 = vld [vmem:[%s2169_s20 + $0xb8] sm:$0xff]  ;;  %v368_v34 = vld [vmem:[%s2169_s20 + $0xc0] sm:$0xff]  ;;  %v379_v37 = vpack.c.bf16 %v351_v29, %v350_v28  ;;  %v380_v38 = vpack.c.bf16 %v353_v31, %v352_v30 }
  0x90   : > { %1458 = vmatpush3.bf16.msra.mxu0 %v1698_v2  ;;  %1607 = vmatpush3.bf16.msra.mxu1 %v1698_v2  ;;  %v369_v35 = vld [vmem:[%s2169_s20 + $0xc8] sm:$0xff]  ;;  %v1706_v36 = vld [vmem:[#allocation7 + $0x10] sm:$0xff]   ;;  %v387_v39 = vpack.c.bf16 %v367_v33, %v366_v32  ;;  %v1707_v41 = vld [vmem:[#allocation7 + $0x18] sm:$0xff]  }
  0x91   : > { %1459 = vmatprep.subr.bf16.mxu0 %v1699_v3  ;;  %1600 = vmatprep.subr.bf16.mxu1 %v1699_v3  ;;  %v388_v40 = vpack.c.bf16 %v369_v35, %v368_v34  ;;  %v354_v42 = vld [vmem:[%s2169_s20 + $0x50] sm:$0xff]  ;;  %v355_v43 = vld [vmem:[%s2169_s20 + $0x58] sm:$0xff]  ;;  %v356_v44 = vld [vmem:[%s2169_s20 + $0x60] sm:$0xff] }
  0x92   : > { %v357_v45 = vld [vmem:[%s2169_s20 + $0x68] sm:$0xff]  ;;  %v370_v46 = vld [vmem:[%s2169_s20 + $0xd0] sm:$0xff]  ;;  %v371_v47 = vld [vmem:[%s2169_s20 + $0xd8] sm:$0xff]  ;;  %v381_v51 = vpack.c.bf16 %v355_v43, %v354_v42 }
  0x93   : > { %v372_v48 = vld [vmem:[%s2169_s20 + $0xe0] sm:$0xff]  ;;  %v373_v49 = vld [vmem:[%s2169_s20 + $0xe8] sm:$0xff]  ;;  %v382_v52 = vpack.c.bf16 %v357_v45, %v356_v44  ;;  %v389_v53 = vpack.c.bf16 %v371_v47, %v370_v46  ;;  %v358_v56 = vld [vmem:[%s2169_s20 + $0x70] sm:$0xff] }
  0x94   : > { %1460 = vmatpush3.bf16.msra.mxu0 %v1699_v3  ;;  %1608 = vmatpush3.bf16.msra.mxu1 %v1699_v3  ;;  %v1708_v50 = vld [vmem:[#allocation7 + $0x20] sm:$0xff]   ;;  %v390_v54 = vpack.c.bf16 %v373_v49, %v372_v48  ;;  %v1709_v55 = vld [vmem:[#allocation7 + $0x28] sm:$0xff]   ;;  %v359_v57 = vld [vmem:[%s2169_s20 + $0x78] sm:$0xff] }
  0x95   : > { %1461 = vmatprep.subr.bf16.mxu0 %v1700_v7  ;;  %1601 = vmatprep.subr.bf16.mxu1 %v1700_v7  ;;  %v374_v58 = vld [vmem:[%s2169_s20 + $0xf0] sm:$0xff]  ;;  %v375_v59 = vld [vmem:[%s2169_s20 + $0xf8] sm:$0xff]  ;;  %v383_v60 = vpack.c.bf16 %v359_v57, %v358_v56  ;;  %v1712_v0 = vld [vmem:[#allocation8] sm:$0xff]   ;;  %s1918_s20 = smov [#allocation10]  }
  0x96   : > { %v391_v61 = vpack.c.bf16 %v375_v59, %v374_v58  ;;  %v1710_v62 = vld [vmem:[#allocation7 + $0x30] sm:$0xff]   ;;  %v1711_v63 = vld [vmem:[#allocation7 + $0x38] sm:$0xff]   ;;  %v1713_v1 = vld [vmem:[#allocation8 + $0x8] sm:$0xff]   ;;  %s1838_s30 = sshll.u32 %s1918_s20, 4  ;;  %s1839_s30 = int_to_ptr.vmem [resolvable:$false] %s1838_s30 }
  0x97   : > { %v1714_v2 = vld [vmem:[#allocation8 + $0x10] sm:$0xff]   ;;  %v1715_v3 = vld [vmem:[#allocation8 + $0x18] sm:$0xff]   ;;  %v1716_v4 = vld [vmem:[#allocation8 + $0x20] sm:$0xff]   ;;  %s1840_s9 = scalar_lea.vmem %s1839_s30, 8192  ;;  %p1841_p12 = scmp.lt.s32.totalorder %s2374_s12, %s1839_s30 }
  0x98   : > { %1462 = vmatpush3.bf16.msra.mxu0 %v1700_v7  ;;  %1609 = vmatpush3.bf16.msra.mxu1 %v1700_v7  ;;  %v1717_v5 = vld [vmem:[#allocation8 + $0x28] sm:$0xff]   ;;  %v2218_v6 = vld [vmem:[%s2424_s2] ss:$0 sm:$0xff]  ;;  %p1842_p1 = scmp.lt.s32.totalorder %s1840_s9, %s1834_s13 }
  0x99   : > { %1463 = vmatprep.subr.bf16.mxu0 %v1701_v11  ;;  %1602 = vmatprep.subr.bf16.mxu1 %v1701_v11 }
  0x9a   : > { %p1843_p2 = por %p1842_p1, %p1841_p12 }
  0x9c   : > { %1464 = vmatpush3.bf16.msra.mxu0 %v1701_v11  ;;  %1610 = vmatpush3.bf16.msra.mxu1 %v1701_v11  ;;  %p1844_p4 = pnand %p1843_p2, %p1837_p7 }
  0x9d   : > { %1465 = vmatprep.subr.bf16.mxu0 %v1702_v12  ;;  %1603 = vmatprep.subr.bf16.mxu1 %v1702_v12 }
  0xa0   : > { %1466 = vmatpush3.bf16.msra.mxu0 %v1702_v12  ;;  %1611 = vmatpush3.bf16.msra.mxu1 %v1702_v12 }
  0xa1   : > { %1467 = vmatprep.subr.bf16.mxu0 %v1703_v13  ;;  %1604 = vmatprep.subr.bf16.mxu1 %v1703_v13 }
  0xa4   : > { %1468 = vmatpush3.bf16.msra.mxu0 %v1703_v13  ;;  %1612 = vmatpush3.bf16.msra.mxu1 %v1703_v13 }
  0xa5   : > { %1501 = vmatprep.subr.bf16.mxu1 %v1704_v22  ;;  %1549 = vmatprep.subr.bf16.mxu0 %v1712_v0 }
  0xa7   : > { %1470 = vmatmul.mubr.bf16.vlgmr.msra.gmra.mrb[0].mxu0 %v377_v23  ;;  %1486 = vmatmul.mubr.bf16.vlgmr.msra.gmra.mrb[0].mxu1 %v385_v25 }
  0xa8   : > { %1473 = vmatprep.mubr.bf16.mxu0 %v378_v24  ;;  %1489 = vmatprep.mubr.bf16.mxu1 %v386_v26 }
  0xa9   : > { %1502 = vmatpush3.bf16.msra.mxu1 %v1704_v22  ;;  %1550 = vmatpush3.bf16.msra.mxu0 %v1712_v0 }
  0xaa   : > { %1503 = vmatprep.subr.bf16.mxu1 %v1705_v27  ;;  %1551 = vmatprep.subr.bf16.mxu0 %v1713_v1 }
  0xad   : > { %1504 = vmatpush3.bf16.msra.mxu1 %v1705_v27  ;;  %1552 = vmatpush3.bf16.msra.mxu0 %v1713_v1 }
  0xae   : > { %1505 = vmatprep.subr.bf16.mxu1 %v1706_v36  ;;  %1553 = vmatprep.subr.bf16.mxu0 %v1714_v2 }
  0xaf   : > { %1474 = vmatmul.mubr.bf16.gmra.mrb[4].mxu0 %v379_v37  ;;  %1490 = vmatmul.mubr.bf16.gmra.mrb[4].mxu1 %v387_v39 }
  0xb0   : > { %1477 = vmatprep.mubr.bf16.mxu0 %v380_v38  ;;  %1493 = vmatprep.mubr.bf16.mxu1 %v388_v40 }
  0xb1   : > { %1506 = vmatpush3.bf16.msra.mxu1 %v1706_v36  ;;  %1554 = vmatpush3.bf16.msra.mxu0 %v1714_v2 }
  0xb2   : > { %1507 = vmatprep.subr.bf16.mxu1 %v1707_v41  ;;  %1555 = vmatprep.subr.bf16.mxu0 %v1715_v3 }
  0xb5   : > { %1508 = vmatpush3.bf16.msra.mxu1 %v1707_v41  ;;  %1556 = vmatpush3.bf16.msra.mxu0 %v1715_v3 }
  0xb6   : > { %1509 = vmatprep.subr.bf16.mxu1 %v1708_v50  ;;  %1557 = vmatprep.subr.bf16.mxu0 %v1716_v4 }
  0xb7   : > { %1478 = vmatmul.mubr.bf16.gmra.mrb[8].mxu0 %v381_v51  ;;  %1494 = vmatmul.mubr.bf16.gmra.mrb[8].mxu1 %v389_v53 }
  0xb8   : > { %1481 = vmatprep.mubr.bf16.mxu0 %v382_v52  ;;  %1497 = vmatprep.mubr.bf16.mxu1 %v390_v54 }
  0xb9   : > { %1510 = vmatpush3.bf16.msra.mxu1 %v1708_v50  ;;  %1558 = vmatpush3.bf16.msra.mxu0 %v1716_v4 }
  0xba   : > { %1511 = vmatprep.subr.bf16.mxu1 %v1709_v55  ;;  %1559 = vmatprep.subr.bf16.mxu0 %v1717_v5 }
  0xbd   : > { %1512 = vmatpush3.bf16.msra.mxu1 %v1709_v55  ;;  %1560 = vmatpush3.bf16.msra.mxu0 %v1717_v5 }
  0xbe   : > { %1513 = vmatprep.subr.bf16.mxu1 %v1710_v62 }
  0xbf   : > { %1482 = vmatmul.mubr.bf16.gmra.mrb[12].mxu0 %v383_v60  ;;  %1498 = vmatmul.mubr.bf16.gmra.mrb[12].mxu1 %v391_v61 }
  0xc1   : > { %1514 = vmatpush3.bf16.msra.mxu1 %v1710_v62 }
  0xc2   : > { %1515 = vmatprep.subr.bf16.mxu1 %v1711_v63 }
  0xc5   : > { %1516 = vmatpush3.bf16.msra.mxu1 %v1711_v63 }
 0x17a   : > { %v1471_v7 = vpop.f32.mrb[0].mxu0  ;;  %v1487_v10 = vpop.f32.mrb[0].mxu1 }
 0x17b   : > { %v506_v8 = vadd.f32 %v1471_v7, %v2218_v6  ;;  %v497_v9 = vpop.f32.mrb[1].mxu0  ;;  %v570_v13 = vadd.f32 %v1487_v10, %v2218_v6  ;;  %v561_v14 = vpop.f32.mrb[1].mxu1 }
 0x17c   : > { %v498_v11 = vadd.f32 %v2218_v6, %v497_v9  ;;  %v1472_v12 = vpop.f32.mrb[2].mxu0  ;;  %v562_v17 = vadd.f32 %v2218_v6, %v561_v14  ;;  %v1488_v18 = vpop.f32.mrb[2].mxu1 }
 0x17d   : > { %v509_v15 = vadd.f32 %v1472_v12, %v2218_v6  ;;  %v500_v16 = vpop.f32.mrb[3].mxu0  ;;  %v642_v20 = vmax.f32 %v570_v13, 0.0  ;;  %v573_v21 = vadd.f32 %v1488_v18, %v2218_v6  ;;  %v564_v22 = vpop.f32.mrb[3].mxu1  ;;  %v626_v23 = vmax.f32 %v506_v8, 0.0 }
 0x17e   : > { %v501_v19 = vadd.f32 %v2218_v6, %v500_v16  ;;  %v640_v25 = vmax.f32 %v562_v17, 0.0  ;;  %v565_v26 = vadd.f32 %v2218_v6, %v564_v22  ;;  %v624_v27 = vmax.f32 %v498_v11, 0.0 }
 0x17f   : > { %v627_v24 = vmax.f32 %v509_v15, 0.0  ;;  %v643_v29 = vmax.f32 %v573_v21, 0.0 }
 0x180   : > { %v625_v28 = vmax.f32 %v501_v19, 0.0  ;;  %v641_v31 = vmax.f32 %v565_v26, 0.0 }
 0x181   : > { %v657_v30 = vpack.c.bf16 %v627_v24, %v626_v23  ;;  %v2228_v34 = vpack.c.bf16 %v643_v29, %v642_v20 }
 0x182   : > { %v656_v32 = vpack.c.bf16 %v625_v28, %v624_v27  ;;  %v1475_v33 = vpop.f32.mrb[4].mxu0  ;;  %v2231_v37 = vpack.c.bf16 %v641_v31, %v640_v25  ;;  %v1491_v38 = vpop.f32.mrb[4].mxu1 }
 0x183   : > { %v522_v35 = vadd.f32 %v1475_v33, %v2218_v6  ;;  %v513_v36 = vpop.f32.mrb[5].mxu0  ;;  %v586_v41 = vadd.f32 %v1491_v38, %v2218_v6  ;;  %v577_v42 = vpop.f32.mrb[5].mxu1 }
 0x184   : > { %v514_v39 = vadd.f32 %v2218_v6, %v513_v36  ;;  %v1476_v40 = vpop.f32.mrb[6].mxu0  ;;  %1517 = vmatprep.mubr.bf16.mxu1 %v656_v32  ;;  %v578_v45 = vadd.f32 %v2218_v6, %v577_v42  ;;  %v1492_v46 = vpop.f32.mrb[6].mxu1 }
 0x185   : > { %v525_v43 = vadd.f32 %v1476_v40, %v2218_v6  ;;  %v516_v44 = vpop.f32.mrb[7].mxu0  ;;  %1518 = vmatmul.mubr.bf16.vlgmr.msra.gmra.mrb[16].mxu1 %v657_v30  ;;  %v646_v48 = vmax.f32 %v586_v41, 0.0  ;;  %v589_v49 = vadd.f32 %v1492_v46, %v2218_v6  ;;  %v580_v50 = vpop.f32.mrb[7].mxu1  ;;  %v630_v51 = vmax.f32 %v522_v35, 0.0 }
 0x186   : > { %v517_v47 = vadd.f32 %v2218_v6, %v516_v44  ;;  %v644_v53 = vmax.f32 %v578_v45, 0.0  ;;  %v581_v54 = vadd.f32 %v2218_v6, %v580_v50  ;;  %v628_v55 = vmax.f32 %v514_v39, 0.0 }
 0x187   : > { %v631_v52 = vmax.f32 %v525_v43, 0.0  ;;  %v647_v57 = vmax.f32 %v589_v49, 0.0 }
 0x188   : > { %v629_v56 = vmax.f32 %v517_v47, 0.0  ;;  %v645_v59 = vmax.f32 %v581_v54, 0.0 }
 0x189   : > { %v659_v58 = vpack.c.bf16 %v631_v52, %v630_v51  ;;  %v2240_v62 = vpack.c.bf16 %v647_v57, %v646_v48 }
 0x18a   : > { %v658_v60 = vpack.c.bf16 %v629_v56, %v628_v55  ;;  %v1479_v61 = vpop.f32.mrb[8].mxu0  ;;  %v666_v1 = vpack.c.bf16 %v645_v59, %v644_v53  ;;  %v1495_v2 = vpop.f32.mrb[8].mxu1  ;;  %v2264_v59 = vld [vmem:[%s2426_s4] ss:$0 sm:$0xff] }
 0x18b   : > { %v538_v63 = vadd.f32 %v1479_v61, %v2218_v6  ;;  %v529_v0 = vpop.f32.mrb[9].mxu0  ;;  %v602_v5 = vadd.f32 %v1495_v2, %v2218_v6  ;;  %v593_v7 = vpop.f32.mrb[9].mxu1 }
 0x18c   : > { %v530_v3 = vadd.f32 %v2218_v6, %v529_v0  ;;  %v1480_v4 = vpop.f32.mrb[10].mxu0  ;;  %1521 = vmatprep.mubr.bf16.mxu1 %v658_v60  ;;  %v594_v10 = vadd.f32 %v2218_v6, %v593_v7  ;;  %v1496_v11 = vpop.f32.mrb[10].mxu1 }
 0x18d   : > { %v541_v8 = vadd.f32 %v1480_v4, %v2218_v6  ;;  %v532_v9 = vpop.f32.mrb[11].mxu0  ;;  %1522 = vmatmul.mubr.bf16.gmra.mrb[20].mxu1 %v659_v58  ;;  %v650_v13 = vmax.f32 %v602_v5, 0.0  ;;  %v605_v14 = vadd.f32 %v1496_v11, %v2218_v6  ;;  %v596_v15 = vpop.f32.mrb[11].mxu1  ;;  %v634_v16 = vmax.f32 %v538_v63, 0.0  ;;  %v1719_v58 = vld [vmem:[#allocation8 + $0x38] sm:$0xff]  }
 0x18e   : > { %v533_v12 = vadd.f32 %v2218_v6, %v532_v9  ;;  %v648_v18 = vmax.f32 %v594_v10, 0.0  ;;  %v597_v19 = vadd.f32 %v2218_v6, %v596_v15  ;;  %v632_v20 = vmax.f32 %v530_v3, 0.0 }
 0x18f   : > { %v635_v17 = vmax.f32 %v541_v8, 0.0  ;;  %v651_v22 = vmax.f32 %v605_v14, 0.0 }
 0x190   : > { %v633_v21 = vmax.f32 %v533_v12, 0.0  ;;  %v649_v24 = vmax.f32 %v597_v19, 0.0 }
 0x191   : > { %v661_v23 = vpack.c.bf16 %v635_v17, %v634_v16  ;;  %v669_v27 = vpack.c.bf16 %v651_v22, %v650_v13 }
 0x192   : > { %v660_v25 = vpack.c.bf16 %v633_v21, %v632_v20  ;;  %v1483_v26 = vpop.f32.mrb[12].mxu0  ;;  %v668_v30 = vpack.c.bf16 %v649_v24, %v648_v18  ;;  %v1499_v31 = vpop.f32.mrb[12].mxu1 }
 0x193   : > { %v554_v28 = vadd.f32 %v1483_v26, %v2218_v6  ;;  %v545_v29 = vpop.f32.mrb[13].mxu0  ;;  %v618_v35 = vadd.f32 %v1499_v31, %v2218_v6  ;;  %v609_v36 = vpop.f32.mrb[13].mxu1 }
 0x194   : > { %v546_v32 = vadd.f32 %v2218_v6, %v545_v29  ;;  %v1484_v33 = vpop.f32.mrb[14].mxu0  ;;  %1525 = vmatprep.mubr.bf16.mxu1 %v660_v25  ;;  %v610_v40 = vadd.f32 %v2218_v6, %v609_v36  ;;  %v1500_v41 = vpop.f32.mrb[14].mxu1 }
 0x195   : > { %v557_v38 = vadd.f32 %v1484_v33, %v2218_v6  ;;  %v548_v39 = vpop.f32.mrb[15].mxu0  ;;  %1526 = vmatmul.mubr.bf16.gmra.mrb[24].mxu1 %v661_v23  ;;  %v654_v43 = vmax.f32 %v618_v35, 0.0  ;;  %v621_v44 = vadd.f32 %v1500_v41, %v2218_v6  ;;  %v612_v45 = vpop.f32.mrb[15].mxu1  ;;  %v638_v46 = vmax.f32 %v554_v28, 0.0 }
 0x196   : > { %v549_v42 = vadd.f32 %v2218_v6, %v548_v39  ;;  %v652_v48 = vmax.f32 %v610_v40, 0.0  ;;  %v613_v49 = vadd.f32 %v2218_v6, %v612_v45  ;;  %v636_v50 = vmax.f32 %v546_v32, 0.0  ;;  %v1718_v6 = vld [vmem:[#allocation8 + $0x30] sm:$0xff]  }
 0x197   : > { %v639_v47 = vmax.f32 %v557_v38, 0.0  ;;  %v655_v52 = vmax.f32 %v621_v44, 0.0  ;;  %1561 = vmatprep.subr.bf16.mxu0 %v1718_v6 }
 0x198   : > { %v637_v51 = vmax.f32 %v549_v42, 0.0  ;;  %v653_v54 = vmax.f32 %v613_v49, 0.0  ;;  %1562 = vmatpush3.bf16.msra.mxu0 %v1718_v6 }
 0x199   : > { %v663_v53 = vpack.c.bf16 %v639_v47, %v638_v46  ;;  %v671_v56 = vpack.c.bf16 %v655_v52, %v654_v43  ;;  %1563 = vmatprep.subr.bf16.mxu0 %v1719_v58 }
 0x19a   : > { %v662_v55 = vpack.c.bf16 %v637_v51, %v636_v50  ;;  %v670_v57 = vpack.c.bf16 %v653_v54, %v652_v48 }
 0x19c   : > { %1529 = vmatprep.mubr.bf16.mxu1 %v662_v55  ;;  %1564 = vmatpush3.bf16.msra.mxu0 %v1719_v58 }
 0x19d   : > { %1530 = vmatmul.mubr.bf16.gmra.mrb[28].mxu1 %v663_v53 }
 0x19e   : > { %1533 = vmatprep.mubr.bf16.mxu1 %v2231_v37 }
 0x1a5   : > { %1534 = vmatmul.mubr.bf16.gmra.mrb[32].mxu1 %v2228_v34 }
 0x1a6   : > { %1537 = vmatprep.mubr.bf16.mxu1 %v666_v1 }
 0x1ad   : > { %1538 = vmatmul.mubr.bf16.gmra.mrb[36].mxu1 %v2240_v62 }
 0x1ae   : > { %1541 = vmatprep.mubr.bf16.mxu1 %v668_v30 }
 0x1b5   : > { %1542 = vmatmul.mubr.bf16.gmra.mrb[40].mxu1 %v669_v27 }
 0x1b6   : > { %1545 = vmatprep.mubr.bf16.mxu1 %v670_v57 }
 0x1bd   : > { %1546 = vmatmul.mubr.bf16.gmra.mrb[44].mxu1 %v671_v56 }
 0x258   : > { %v1519_v37 = vpop.f32.mrb[16].mxu1 }
 0x259   : > { %v786_v34 = vadd.f32 %v1519_v37, %v2264_v59  ;;  %v777_v60 = vpop.f32.mrb[17].mxu1 }
 0x25a   : > { %v778_v61 = vadd.f32 %v2264_v59, %v777_v60  ;;  %v1520_v62 = vpop.f32.mrb[18].mxu1 }
 0x25b   : > { %v789_v63 = vadd.f32 %v1520_v62, %v2264_v59  ;;  %v780_v0 = vpop.f32.mrb[19].mxu1  ;;  %v906_v2 = vmax.f32 %v786_v34, 0.0 }
 0x25c   : > { %v781_v1 = vadd.f32 %v2264_v59, %v780_v0  ;;  %v904_v4 = vmax.f32 %v778_v61, 0.0 }
 0x25d   : > { %v907_v3 = vmax.f32 %v789_v63, 0.0 }
 0x25e   : > { %v905_v5 = vmax.f32 %v781_v1, 0.0 }
 0x25f   : > { %v937_v7 = vpack.c.bf16 %v907_v3, %v906_v2 }
 0x260   : > { %v936_v8 = vpack.c.bf16 %v905_v5, %v904_v4  ;;  %v1523_v9 = vpop.f32.mrb[20].mxu1 }
 0x261   : > { %v802_v10 = vadd.f32 %v1523_v9, %v2264_v59  ;;  %v793_v11 = vpop.f32.mrb[21].mxu1 }
 0x262   : > { %v794_v12 = vadd.f32 %v2264_v59, %v793_v11  ;;  %v1524_v13 = vpop.f32.mrb[22].mxu1  ;;  %1565 = vmatprep.mubr.bf16.mxu0 %v936_v8 }
 0x263   : > { %v805_v14 = vadd.f32 %v1524_v13, %v2264_v59  ;;  %v796_v15 = vpop.f32.mrb[23].mxu1  ;;  %1566 = vmatmul.mubr.bf16.vlgmr.msra.gmra.mrb[16].mxu0 %v937_v7  ;;  %v910_v17 = vmax.f32 %v802_v10, 0.0 }
 0x264   : > { %v797_v16 = vadd.f32 %v2264_v59, %v796_v15  ;;  %v908_v19 = vmax.f32 %v794_v12, 0.0 }
 0x265   : > { %v911_v18 = vmax.f32 %v805_v14, 0.0 }
 0x266   : > { %v909_v20 = vmax.f32 %v797_v16, 0.0 }
 0x267   : > { %v939_v21 = vpack.c.bf16 %v911_v18, %v910_v17 }
 0x268   : > { %v938_v22 = vpack.c.bf16 %v909_v20, %v908_v19  ;;  %v1527_v23 = vpop.f32.mrb[24].mxu1 }
 0x269   : > { %v818_v24 = vadd.f32 %v1527_v23, %v2264_v59  ;;  %v809_v25 = vpop.f32.mrb[25].mxu1 }
 0x26a   : > { %v810_v26 = vadd.f32 %v2264_v59, %v809_v25  ;;  %v1528_v27 = vpop.f32.mrb[26].mxu1  ;;  %1569 = vmatprep.mubr.bf16.mxu0 %v938_v22 }
 0x26b   : > { %v821_v28 = vadd.f32 %v1528_v27, %v2264_v59  ;;  %v812_v29 = vpop.f32.mrb[27].mxu1  ;;  %1570 = vmatmul.mubr.bf16.gmra.mrb[20].mxu0 %v939_v21  ;;  %v914_v31 = vmax.f32 %v818_v24, 0.0 }
 0x26c   : > { %v813_v30 = vadd.f32 %v2264_v59, %v812_v29  ;;  %v912_v33 = vmax.f32 %v810_v26, 0.0 }
 0x26d   : > { %v915_v32 = vmax.f32 %v821_v28, 0.0 }
 0x26e   : > { %v913_v35 = vmax.f32 %v813_v30, 0.0 }
 0x26f   : > { %v941_v36 = vpack.c.bf16 %v915_v32, %v914_v31 }
 0x270   : > { %v940_v38 = vpack.c.bf16 %v913_v35, %v912_v33  ;;  %v1531_v39 = vpop.f32.mrb[28].mxu1 }
 0x271   : > { %v834_v40 = vadd.f32 %v1531_v39, %v2264_v59  ;;  %v825_v41 = vpop.f32.mrb[29].mxu1 }
 0x272   : > { %v826_v42 = vadd.f32 %v2264_v59, %v825_v41  ;;  %v1532_v43 = vpop.f32.mrb[30].mxu1  ;;  %1573 = vmatprep.mubr.bf16.mxu0 %v940_v38 }
 0x273   : > { %v837_v44 = vadd.f32 %v1532_v43, %v2264_v59  ;;  %v828_v45 = vpop.f32.mrb[31].mxu1  ;;  %1574 = vmatmul.mubr.bf16.gmra.mrb[24].mxu0 %v941_v36  ;;  %v918_v47 = vmax.f32 %v834_v40, 0.0 }
 0x274   : > { %v829_v46 = vadd.f32 %v2264_v59, %v828_v45  ;;  %v916_v49 = vmax.f32 %v826_v42, 0.0 }
 0x275   : > { %v919_v48 = vmax.f32 %v837_v44, 0.0 }
 0x276   : > { %v917_v50 = vmax.f32 %v829_v46, 0.0  ;;  %v2301_v46 = vld [vmem:[%s2428_s6] ss:$0 sm:$0xff] }
 0x277   : > { %v943_v51 = vpack.c.bf16 %v919_v48, %v918_v47 }
 0x278   : > { %v942_v52 = vpack.c.bf16 %v917_v50, %v916_v49  ;;  %v1535_v53 = vpop.f32.mrb[32].mxu1 }
 0x279   : > { %v850_v54 = vadd.f32 %v1535_v53, %v2264_v59  ;;  %v841_v55 = vpop.f32.mrb[33].mxu1 }
 0x27a   : > { %v842_v56 = vadd.f32 %v2264_v59, %v841_v55  ;;  %v1536_v57 = vpop.f32.mrb[34].mxu1  ;;  %1577 = vmatprep.mubr.bf16.mxu0 %v942_v52 }
 0x27b   : > { %v853_v6 = vadd.f32 %v1536_v57, %v2264_v59  ;;  %v844_v58 = vpop.f32.mrb[35].mxu1  ;;  %1578 = vmatmul.mubr.bf16.gmra.mrb[28].mxu0 %v943_v51  ;;  %v922_v34 = vmax.f32 %v850_v54, 0.0 }
 0x27c   : > { %v845_v37 = vadd.f32 %v2264_v59, %v844_v58  ;;  %v920_v61 = vmax.f32 %v842_v56, 0.0 }
 0x27d   : > { %v923_v60 = vmax.f32 %v853_v6, 0.0 }
 0x27e   : > { %v921_v62 = vmax.f32 %v845_v37, 0.0 }
 0x27f   : > { %v945_v63 = vpack.c.bf16 %v923_v60, %v922_v34 }
 0x280   : > { %v944_v0 = vpack.c.bf16 %v921_v62, %v920_v61  ;;  %v1539_v1 = vpop.f32.mrb[36].mxu1 }
 0x281   : > { %v866_v2 = vadd.f32 %v1539_v1, %v2264_v59  ;;  %v857_v3 = vpop.f32.mrb[37].mxu1 }
 0x282   : > { %v858_v4 = vadd.f32 %v2264_v59, %v857_v3  ;;  %v1540_v5 = vpop.f32.mrb[38].mxu1  ;;  %1581 = vmatprep.mubr.bf16.mxu0 %v944_v0 }
 0x283   : > { %v869_v7 = vadd.f32 %v1540_v5, %v2264_v59  ;;  %v860_v8 = vpop.f32.mrb[39].mxu1  ;;  %1582 = vmatmul.mubr.bf16.gmra.mrb[32].mxu0 %v945_v63  ;;  %v926_v10 = vmax.f32 %v866_v2, 0.0 }
 0x284   : > { %v861_v9 = vadd.f32 %v2264_v59, %v860_v8  ;;  %v924_v12 = vmax.f32 %v858_v4, 0.0 }
 0x285   : > { %v927_v11 = vmax.f32 %v869_v7, 0.0 }
 0x286   : > { %v925_v13 = vmax.f32 %v861_v9, 0.0 }
 0x287   : > { %v947_v14 = vpack.c.bf16 %v927_v11, %v926_v10 }
 0x288   : > { %v946_v15 = vpack.c.bf16 %v925_v13, %v924_v12  ;;  %v1543_v16 = vpop.f32.mrb[40].mxu1 }
 0x289   : > { %v882_v17 = vadd.f32 %v1543_v16, %v2264_v59  ;;  %v873_v18 = vpop.f32.mrb[41].mxu1 }
 0x28a   : > { %v874_v19 = vadd.f32 %v2264_v59, %v873_v18  ;;  %v1544_v20 = vpop.f32.mrb[42].mxu1  ;;  %1585 = vmatprep.mubr.bf16.mxu0 %v946_v15 }
 0x28b   : > { %v885_v21 = vadd.f32 %v1544_v20, %v2264_v59  ;;  %v876_v22 = vpop.f32.mrb[43].mxu1  ;;  %1586 = vmatmul.mubr.bf16.gmra.mrb[36].mxu0 %v947_v14  ;;  %v930_v24 = vmax.f32 %v882_v17, 0.0 }
 0x28c   : > { %v877_v23 = vadd.f32 %v2264_v59, %v876_v22  ;;  %v928_v26 = vmax.f32 %v874_v19, 0.0 }
 0x28d   : > { %v931_v25 = vmax.f32 %v885_v21, 0.0 }
 0x28e   : > { %v929_v27 = vmax.f32 %v877_v23, 0.0 }
 0x28f   : > { %v949_v28 = vpack.c.bf16 %v931_v25, %v930_v24 }
 0x290   : > { %v948_v29 = vpack.c.bf16 %v929_v27, %v928_v26  ;;  %v1547_v30 = vpop.f32.mrb[44].mxu1 }
 0x291   : > { %v898_v31 = vadd.f32 %v1547_v30, %v2264_v59  ;;  %v889_v32 = vpop.f32.mrb[45].mxu1 }
 0x292   : > { %v890_v33 = vadd.f32 %v2264_v59, %v889_v32  ;;  %v1548_v35 = vpop.f32.mrb[46].mxu1  ;;  %1589 = vmatprep.mubr.bf16.mxu0 %v948_v29 }
 0x293   : > { %v901_v36 = vadd.f32 %v1548_v35, %v2264_v59  ;;  %v892_v38 = vpop.f32.mrb[47].mxu1  ;;  %1590 = vmatmul.mubr.bf16.gmra.mrb[40].mxu0 %v949_v28  ;;  %v934_v40 = vmax.f32 %v898_v31, 0.0 }
 0x294   : > { %v893_v39 = vadd.f32 %v2264_v59, %v892_v38  ;;  %v932_v42 = vmax.f32 %v890_v33, 0.0 }
 0x295   : > { %v935_v41 = vmax.f32 %v901_v36, 0.0 }
 0x296   : > { %v933_v43 = vmax.f32 %v893_v39, 0.0 }
 0x297   : > { %v951_v44 = vpack.c.bf16 %v935_v41, %v934_v40 }
 0x298   : > { %v950_v45 = vpack.c.bf16 %v933_v43, %v932_v42 }
 0x29a   : > { %1593 = vmatprep.mubr.bf16.mxu0 %v950_v45 }
 0x29b   : > { %1594 = vmatmul.mubr.bf16.gmra.mrb[44].mxu0 %v951_v44 }
 0x336   : > { %v1567_v47 = vpop.f32.mrb[16].mxu0 }
 0x337   : > { %v1066_v48 = vadd.f32 %v1567_v47, %v2301_v46  ;;  %v1057_v49 = vpop.f32.mrb[17].mxu0 }
 0x338   : > { %v1058_v50 = vadd.f32 %v2301_v46, %v1057_v49  ;;  %v1568_v59 = vpop.f32.mrb[18].mxu0 }
 0x339   : > { %1186 = vst [vmem:[%s2307_s15 + $0x10] sm:$0xff] %v1066_v48  ;;  %v1069_v51 = vadd.f32 %v1568_v59, %v2301_v46  ;;  %v1060_v52 = vpop.f32.mrb[19].mxu0 }
 0x33a   : > { %1184 = vst [vmem:[%s2307_s15] sm:$0xff] %v1058_v50  ;;  %v1061_v53 = vadd.f32 %v2301_v46, %v1060_v52 }
 0x33b   : > { %1187 = vst [vmem:[%s2307_s15 + $0x18] sm:$0xff] %v1069_v51 }
 0x33c   : > { %1185 = vst [vmem:[%s2307_s15 + $0x8] sm:$0xff] %v1061_v53 }
 0x33e   : > { %v1571_v54 = vpop.f32.mrb[20].mxu0 }
 0x33f   : > { %v1082_v55 = vadd.f32 %v1571_v54, %v2301_v46  ;;  %v1073_v56 = vpop.f32.mrb[21].mxu0 }
 0x340   : > { %v1074_v57 = vadd.f32 %v2301_v46, %v1073_v56  ;;  %v1572_v6 = vpop.f32.mrb[22].mxu0 }
 0x341   : > { %1190 = vst [vmem:[%s2307_s15 + $0x30] sm:$0xff] %v1082_v55  ;;  %v1085_v58 = vadd.f32 %v1572_v6, %v2301_v46  ;;  %v1076_v37 = vpop.f32.mrb[23].mxu0 }
 0x342   : > { %1188 = vst [vmem:[%s2307_s15 + $0x20] sm:$0xff] %v1074_v57  ;;  %v1077_v34 = vadd.f32 %v2301_v46, %v1076_v37 }
 0x343   : > { %1191 = vst [vmem:[%s2307_s15 + $0x38] sm:$0xff] %v1085_v58 }
 0x344   : > { %1189 = vst [vmem:[%s2307_s15 + $0x28] sm:$0xff] %v1077_v34 }
 0x346   : > { %v1575_v60 = vpop.f32.mrb[24].mxu0 }
 0x347   : > { %v1098_v61 = vadd.f32 %v1575_v60, %v2301_v46  ;;  %v1089_v62 = vpop.f32.mrb[25].mxu0 }
 0x348   : > { %v1090_v63 = vadd.f32 %v2301_v46, %v1089_v62  ;;  %v1576_v0 = vpop.f32.mrb[26].mxu0 }
 0x349   : > { %1194 = vst [vmem:[%s2307_s15 + $0x50] sm:$0xff] %v1098_v61  ;;  %v1101_v1 = vadd.f32 %v1576_v0, %v2301_v46  ;;  %v1092_v2 = vpop.f32.mrb[27].mxu0 }
 0x34a   : > { %1192 = vst [vmem:[%s2307_s15 + $0x40] sm:$0xff] %v1090_v63  ;;  %v1093_v3 = vadd.f32 %v2301_v46, %v1092_v2 }
 0x34b   : > { %1195 = vst [vmem:[%s2307_s15 + $0x58] sm:$0xff] %v1101_v1 }
 0x34c   : > { %1193 = vst [vmem:[%s2307_s15 + $0x48] sm:$0xff] %v1093_v3 }
 0x34e   : > { %v1579_v4 = vpop.f32.mrb[28].mxu0 }
 0x34f   : > { %v1114_v5 = vadd.f32 %v1579_v4, %v2301_v46  ;;  %v1105_v7 = vpop.f32.mrb[29].mxu0 }
 0x350   : > { %v1106_v8 = vadd.f32 %v2301_v46, %v1105_v7  ;;  %v1580_v9 = vpop.f32.mrb[30].mxu0 }
 0x351   : > { %1198 = vst [vmem:[%s2307_s15 + $0x70] sm:$0xff] %v1114_v5  ;;  %v1117_v10 = vadd.f32 %v1580_v9, %v2301_v46  ;;  %v1108_v11 = vpop.f32.mrb[31].mxu0 }
 0x352   : > { %1196 = vst [vmem:[%s2307_s15 + $0x60] sm:$0xff] %v1106_v8  ;;  %v1109_v12 = vadd.f32 %v2301_v46, %v1108_v11 }
 0x353   : > { %1199 = vst [vmem:[%s2307_s15 + $0x78] sm:$0xff] %v1117_v10 }
 0x354   : > { %1197 = vst [vmem:[%s2307_s15 + $0x68] sm:$0xff] %v1109_v12 }
 0x356   : > { %v1583_v13 = vpop.f32.mrb[32].mxu0 }
 0x357   : > { %v1130_v14 = vadd.f32 %v1583_v13, %v2301_v46  ;;  %v1121_v15 = vpop.f32.mrb[33].mxu0 }
 0x358   : > { %v1122_v16 = vadd.f32 %v2301_v46, %v1121_v15  ;;  %v1584_v17 = vpop.f32.mrb[34].mxu0 }
 0x359   : > { %1202 = vst [vmem:[%s2307_s15 + $0x90] sm:$0xff] %v1130_v14  ;;  %v1133_v18 = vadd.f32 %v1584_v17, %v2301_v46  ;;  %v1124_v19 = vpop.f32.mrb[35].mxu0 }
 0x35a   : > { %1200 = vst [vmem:[%s2307_s15 + $0x80] sm:$0xff] %v1122_v16  ;;  %v1125_v20 = vadd.f32 %v2301_v46, %v1124_v19 }
 0x35b   : > { %1203 = vst [vmem:[%s2307_s15 + $0x98] sm:$0xff] %v1133_v18 }
 0x35c   : > { %1201 = vst [vmem:[%s2307_s15 + $0x88] sm:$0xff] %v1125_v20 }
 0x35e   : > { %v1587_v21 = vpop.f32.mrb[36].mxu0 }
 0x35f   : > { %v1146_v22 = vadd.f32 %v1587_v21, %v2301_v46  ;;  %v1137_v23 = vpop.f32.mrb[37].mxu0 }
 0x360   : > { %v1138_v24 = vadd.f32 %v2301_v46, %v1137_v23  ;;  %v1588_v25 = vpop.f32.mrb[38].mxu0 }
 0x361   : > { %1206 = vst [vmem:[%s2307_s15 + $0xb0] sm:$0xff] %v1146_v22  ;;  %v1149_v26 = vadd.f32 %v1588_v25, %v2301_v46  ;;  %v1140_v27 = vpop.f32.mrb[39].mxu0 }
 0x362   : > { %1204 = vst [vmem:[%s2307_s15 + $0xa0] sm:$0xff] %v1138_v24  ;;  %v1141_v28 = vadd.f32 %v2301_v46, %v1140_v27 }
 0x363   : > { %1207 = vst [vmem:[%s2307_s15 + $0xb8] sm:$0xff] %v1149_v26 }
 0x364   : > { %1205 = vst [vmem:[%s2307_s15 + $0xa8] sm:$0xff] %v1141_v28 }
 0x366   : > { %v1591_v29 = vpop.f32.mrb[40].mxu0 }
 0x367   : > { %v1162_v30 = vadd.f32 %v1591_v29, %v2301_v46  ;;  %v1153_v31 = vpop.f32.mrb[41].mxu0 }
 0x368   : > { %v1154_v32 = vadd.f32 %v2301_v46, %v1153_v31  ;;  %v1592_v33 = vpop.f32.mrb[42].mxu0 }
 0x369   : > { %1210 = vst [vmem:[%s2307_s15 + $0xd0] sm:$0xff] %v1162_v30  ;;  %v1165_v35 = vadd.f32 %v1592_v33, %v2301_v46  ;;  %v1156_v36 = vpop.f32.mrb[43].mxu0 }
 0x36a   : > { %1208 = vst [vmem:[%s2307_s15 + $0xc0] sm:$0xff] %v1154_v32  ;;  %v1157_v38 = vadd.f32 %v2301_v46, %v1156_v36 }
 0x36b   : > { %1211 = vst [vmem:[%s2307_s15 + $0xd8] sm:$0xff] %v1165_v35 }
 0x36c   : > { %1209 = vst [vmem:[%s2307_s15 + $0xc8] sm:$0xff] %v1157_v38 }
 0x36e   : > { %v1595_v39 = vpop.f32.mrb[44].mxu0 }
 0x36f   : > { %v1178_v40 = vadd.f32 %v1595_v39, %v2301_v46  ;;  %v1169_v41 = vpop.f32.mrb[45].mxu0 }
 0x370   : > { %v1170_v42 = vadd.f32 %v2301_v46, %v1169_v41  ;;  %v1596_v43 = vpop.f32.mrb[46].mxu0 }
 0x371   : > { %1214 = vst [vmem:[%s2307_s15 + $0xf0] sm:$0xff] %v1178_v40  ;;  %v1181_v44 = vadd.f32 %v1596_v43, %v2301_v46  ;;  %v1172_v45 = vpop.f32.mrb[47].mxu0 }
 0x372   : > { %1212 = vst [vmem:[%s2307_s15 + $0xe0] sm:$0xff] %v1170_v42  ;;  %v1173_v47 = vadd.f32 %v2301_v46, %v1172_v45 }
 0x373   : > { %1215 = vst [vmem:[%s2307_s15 + $0xf8] sm:$0xff] %v1181_v44 }
 0x374   : > { %1213 = vst [vmem:[%s2307_s15 + $0xe8] sm:$0xff] %v1173_v47 }
 0x375   : > { %1847 = shalt.err (!%p1844_p4)
}
 0x376   : > { %s1848_s23 = scalar_lea.hbm %s2372_s16, 4096  ;;  %s1852_s14 = scalar_lea.hbm %s2429_s7, 8192 }
 0x377   : > { %p1849_p9 = scmp.ne.s32.totalorder %s2372_s16, %s1848_s23  ;;  %p1853_p8 = scmp.lt.u32.totalorder %s2372_s16, %s2429_s7 }
 0x378   : > { %p1854_p13 = scmp.lt.u32.totalorder %s1852_s14, %s1848_s23  ;;  %p1856_p10 = scmp.lt.u32.totalorder %s1848_s23, %s2372_s16 }
 0x379   : > { %p1850_p0 = pnand %p1849_p9, %p2115_p5 }
 0x37a   : > { %p1855_p6 = por %p1854_p13, %p1853_p8 }
 0x37b   : > { %p1851_p11 = pneg %p1850_p0 }
 0x37c   : > { %p1857_p3 = por %p1856_p10, %p1855_p6 }
 0x37e   : > { %p1858_p7 = pnand %p1857_p3, %p1851_p11 }
 0x380   : > { %1861 = shalt.err (!%p1858_p7)
}
 0x381   : > { %s1919_s8 = smov 128   ;;  %s1920_s17 = smov 8  }
 0x382   : > { %1627 = dma.vmem_to_hbm [thread:$0]  (%p2115_p5), %s2374_s12, 4096, %s2372_s16, %s1217_s28, %s1919_s8, %s1919_s8, %s1920_s17  }
 0x383 PF: > { %s2449_s13 = sld [smem:[#allocation15_spill]]  ;;  %s1245_s20 = sand.u32 1, %s1896_s24  }
 0x384   : > { %p2451_p1 = scmp.ge.s32.totalorder %s1908_s27, 2  ;;  %s1246_s30 = scalar_lea.sflag [#allocation4], %s1245_s20 }
 0x389   : > { %p2450_p12 = scmp.ne.s32.totalorder %s2449_s13, 0 }
 0x38b   : > { %p1644_p2 = pnand %p2451_p1, %p2450_p12 }
 0x38d   : > { %1891 = dma.done.wait (!%p1644_p2), %s1246_s30, 4096  }
 0x38e   : > { %1893 = vsyncadd (!%p1644_p2), %s1246_s30, 4294963200  ;;  %p22_p4 = scmp.ge.s32.totalorder %s2101_s22, 4   ;;  %s2452_s24 = smov %s1900_s25 }
 0x38f   : > { %s2453_s25 = smov %s1904_s26  ;;  %s2454_s26 = smov %s2111_s18 }
 0x390   : > { %s2455_s27 = smov %s2101_s22  ;;  %24 = sbr.rel (!%p22_p4) target bundleno = 7 (0x7), region = 105 }
 0x397   :  { %1251 = vsyncpa [#allocation3], 1 }
 0x398   :  { %1253 = vsyncpa [#allocation3 + $0x1], 1 }
 0x399   :  { %1254 = vsyncpa [#allocation6], 1 }
 0x39a   :  { %1255 = vsyncpa [#allocation9], 1 }
 0x39b   :  { %1256 = vsyncpa [#allocation4], 1 }
 0x39c   :  { %1258 = vsyncpa [#allocation4 + $0x1], 1 }

// kernel: tpu_custom_call.1
= control target key start
LH: loop header
LB: loop body
LE: loop exit
PB: predicated region body
PF: predicated region fallthrough
CT: control target
= control target key end

     0   :  { %12 = vsyncpa [#allocation3], 0  ;;  %s2422_s0 = inlined_call_operand.hbm [shape: f32[512,128], index: 0, kind: input, shape index: {}]   ;;  %s2423_s1 = inlined_call_operand.hbm [shape: bf16[128,128], index: 1, kind: input, shape index: {}]   ;;  %s2424_s2 = inlined_call_operand.vmem [shape: f32[1,128], index: 2, kind: input, shape index: {}]   ;;  %s2425_s3 = inlined_call_operand.hbm [shape: bf16[128,128], index: 3, kind: input, shape index: {}]   ;;  %s2426_s4 = inlined_call_operand.vmem [shape: f32[1,128], index: 4, kind: input, shape index: {}]   ;;  %s2427_s5 = inlined_call_operand.hbm [shape: bf16[128,128], index: 5, kind: input, shape index: {}]   ;;  %s2428_s6 = inlined_call_operand.vmem [shape: f32[1,128], index: 6, kind: input, shape index: {}]   ;;  %s2429_s7 = inlined_call_operand.hbm [shape: f32[512,128], index: 7, kind: output, shape index: {}]  }
   0x1   :  { %14 = vsyncpa [#allocation3 + $0x1], 0 }
   0x2   :  { %15 = vsyncpa [#allocation6], 0 }
   0x3   :  { %16 = vsyncpa [#allocation9], 0 }
   0x4   :  { %17 = vsyncpa [#allocation4], 0 }
   0x5   :  { %19 = vsyncpa [#allocation4 + $0x1], 0  ;;  %s1961_s24 = smov 0   ;;  %s1963_s25 = smov 0  }
   0x6   :  { %s1965_s26 = smov 0   ;;  %s1967_s27 = smov 0  }
   0x7 LB: > { %s1982_s28 = sadd.s32 4294967295, %s1908_s27   ;;  %s1332_s29 = sadd.s32 4294967294, %s1908_s27   ;;  %s1908_s27 = sphi %s1967_s27, %s2455_s27   ;;  %s1904_s26 = sphi %s1965_s26, %s2454_s26   ;;  %s1900_s25 = sphi %s1963_s25, %s2453_s25   ;;  %s1896_s24 = sphi %s1961_s24, %s2452_s24  }
   0x8   : > { %p45_p0 = scmp.ne.s32.totalorder %s1900_s25, %s1896_s24  ;;  %p2430_p1 = scmp.eq.s32.totalorder %s1982_s28, 0 }
   0x9   : > { %p201_p3 = scmp.eq.s32.totalorder %s1332_s29, 1  ;;  %p1333_p5 = scmp.ge.s32.totalorder %s1908_s27, 1 }
   0xa   : > { %p1991_p4 = por %p2430_p1, %p45_p0  ;;  %p208_p7 = scmp.lt.s32.totalorder %s1908_s27, 3 }
   0xb   : > { %p1996_p6 = por %p201_p3, %p45_p0  ;;  %s1910_s10 = smov [#allocation5]  }
   0xc   : > { %s2434_s30 = scalar_select %p1991_p4, 1, 0 }
   0xd   : > { %s2435_s8 = scalar_select %p1996_p6, 1, 0 }
   0xe   : > { %p2001_p8 = pnand %p1333_p5, %p208_p7  ;;  %s220_s11 = sshll.u32 %s1910_s10, 4  ;;  %s2005_s11 = int_to_ptr.vmem [resolvable:$true] %s220_s11 }
   0xf   : > { %2436 = sst [smem:[#allocation15_spill]] %s2435_s8  ;;  %s1911_s13 = smov [#allocation7]  }
  0x10   : > { %s2437_s9 = scalar_select %p2001_p8, 1, 0 }
  0x11   : > { %p1629_p9 = pneg %p2001_p8  ;;  %s236_s14 = sshll.u32 %s1911_s13, 4  ;;  %s2016_s14 = int_to_ptr.vmem [resolvable:$true] %s236_s14 }
  0x12   : > { %s1912_s15 = smov [#allocation8]   ;;  %s1720_s19 = scalar_lea.hbm %s2423_s1, 1024 }
  0x13   : > { %p2012_p11 = pnand %p1629_p9, %p2430_p1  ;;  %s2018_s16 = sshll.u32 %s1912_s15, 4  ;;  %s253_s16 = int_to_ptr.vmem [resolvable:$true] %s2018_s16 }
  0x14   : > { %p1721_p12 = scmp.ne.s32.totalorder %s2423_s1, %s1720_s19  ;;  %p1727_p5 = scmp.lt.u32.totalorder %s1720_s19, %s2423_s1 }
  0x15   : > { %p2028_p13 = pneg %p2012_p11 }
  0x17   : > { %p1723_p0 = pnand %p2028_p13, %p1721_p12 }
  0x19   : > { %p1724_p3 = pneg %p1723_p0 }
  0x1b   : > { %p1729_p7 = pnand %p1727_p5, %p1724_p3 }
  0x1d   : > { %1732 = shalt.err (!%p1729_p7)
}
  0x1e   : > { %s1733_s10 = scalar_lea.vmem %s2005_s11, 1024  ;;  %p1741_p2 = scmp.lt.s32.totalorder %s2005_s11, %s2005_s11 }
  0x1f   : > { %p1734_p9 = scmp.ne.s32.totalorder %s2005_s11, %s1733_s10  ;;  %p1742_p6 = scmp.lt.s32.totalorder %s1733_s10, %s1733_s10 }
  0x21   : > { %p1736_p10 = pnand %p1734_p9, %p2028_p13  ;;  %p1743_p12 = por %p1742_p6, %p1741_p2 }
  0x23   : > { %p1737_p1 = pneg %p1736_p10 }
  0x25   : > { %p1744_p0 = pnand %p1743_p12, %p1737_p1 }
  0x27   : > { %1747 = shalt.err (!%p1744_p0)
}
  0x28   : > { %s1913_s13 = smov 64   ;;  %s1914_s15 = smov 4  }
  0x29   : > { %1632 = dma.hbm_to_vmem [thread:$0]  (!%p2012_p11), %s2423_s1, 1024, %s2005_s11, [#allocation6], %s1913_s13, %s1913_s13, %s1914_s15  }
  0x2a   : > { %s1748_s21 = scalar_lea.hbm %s2425_s3, 1024 }
  0x2b   : > { %p1749_p1 = scmp.ne.s32.totalorder %s2425_s3, %s1748_s21  ;;  %p1755_p10 = scmp.lt.u32.totalorder %s1748_s21, %s2425_s3 }
  0x2d   : > { %p1751_p2 = pnand %p1749_p1, %p2028_p13 }
  0x2f   : > { %p1752_p6 = pneg %p1751_p2 }
  0x31   : > { %p1757_p3 = pnand %p1755_p10, %p1752_p6 }
  0x33   : > { %1760 = shalt.err (!%p1757_p3)
}
  0x34   : > { %s1761_s11 = scalar_lea.vmem %s2016_s14, 1024  ;;  %p1769_p12 = scmp.lt.s32.totalorder %s2016_s14, %s2016_s14 }
  0x35   : > { %p1762_p5 = scmp.ne.s32.totalorder %s2016_s14, %s1761_s11  ;;  %p1770_p0 = scmp.lt.s32.totalorder %s1761_s11, %s1761_s11 }
  0x37   : > { %p1764_p7 = pnand %p1762_p5, %p2028_p13  ;;  %p1771_p1 = por %p1770_p0, %p1769_p12 }
  0x39   : > { %p1765_p9 = pneg %p1764_p7 }
  0x3b   : > { %p1772_p2 = pnand %p1771_p1, %p1765_p9 }
  0x3d   : > { %1775 = shalt.err (!%p1772_p2)
}
  0x3e   : > { %1635 = dma.hbm_to_vmem [thread:$0]  (!%p2012_p11), %s2425_s3, 1024, %s2016_s14, [#allocation6], %s1913_s13, %s1913_s13, %s1914_s15  }
  0x3f   : > { %s1776_s20 = scalar_lea.hbm %s2427_s5, 1024 }
  0x40   : > { %p1777_p6 = scmp.ne.s32.totalorder %s2427_s5, %s1776_s20  ;;  %p1783_p5 = scmp.lt.u32.totalorder %s1776_s20, %s2427_s5 }
  0x42   : > { %p1779_p10 = pnand %p1777_p6, %p2028_p13 }
  0x44   : > { %p1780_p3 = pneg %p1779_p10 }
  0x46   : > { %p1785_p7 = pnand %p1783_p5, %p1780_p3 }
  0x48   : > { %1788 = shalt.err (!%p1785_p7)
}
  0x49   : > { %s1789_s11 = scalar_lea.vmem %s253_s16, 1024  ;;  %p1797_p1 = scmp.lt.s32.totalorder %s253_s16, %s253_s16 }
  0x4a   : > { %p1790_p9 = scmp.ne.s32.totalorder %s253_s16, %s1789_s11  ;;  %p1798_p2 = scmp.lt.s32.totalorder %s1789_s11, %s1789_s11 }
  0x4c   : > { %p1792_p12 = pnand %p1790_p9, %p2028_p13  ;;  %p1799_p4 = por %p1798_p2, %p1797_p1 }
  0x4e   : > { %p1793_p0 = pneg %p1792_p12 }
  0x50   : > { %p1800_p8 = pnand %p1799_p4, %p1793_p0 }
  0x52   : > { %1803 = shalt.err (!%p1800_p8)
}
  0x53   : > { %1638 = dma.hbm_to_vmem [thread:$0]  (!%p2012_p11), %s2427_s5, 1024, %s253_s16, [#allocation9], %s1913_s13, %s1913_s13, %s1914_s15  }
  0x54   : > { %s2101_s22 = sadd.s32 1, %s1908_s27   ;;  %s32_s17 = sadd.s32 1, %s1904_s26 }
  0x55   : > { %s29_s12 = ssub.s32 %s1908_s27, %s2101_s22  ;;  %p39_p8 = scmp.ne.s32.totalorder %s1904_s26, %s1900_s25 }
  0x56   : > { %p30_p4 = scmp.eq.s32.totalorder %s29_s12, 0  ;;  %p40_p13 = scmp.eq.s32.totalorder %s1908_s27, 0 }
  0x57   : > { %p1650_p6 = scmp.lt.s32.totalorder %s1908_s27, 2  ;;  %p2440_p3 = scmp.eq.s32.totalorder %s1982_s28, 1 }
  0x58   : > { %s2111_s18 = scalar_select %p30_p4, %s1904_s26, %s32_s17  }
  0x59   : > { %p41_p10 = por %p40_p13, %p39_p8  ;;  %p2115_p5 = por %p2440_p3, %p39_p8 }
  0x5a   : > { %s269_s20 = sand.u32 1, %s1904_s26   ;;  %s1379_s21 = sshll.u32 %s1908_s27, 12 }
  0x5b   : > { %s1338_s16 = sshll.u32 %s269_s20, 8  ;;  %s2124_s23 = scalar_lea.hbm %s2422_s0, %s1379_s21 }
  0x5c   : > { %s273_s29 = scalar_lea.vmem [#allocation2], %s1338_s16  ;;  %p2126_p11 = pnand %p1650_p6, %p41_p10 }
  0x5d   : > { %s280_s10 = sshll.u32 %s273_s29, 4  ;;  %s2132_s14 = scalar_lea.sflag [#allocation3], %s269_s20  ;;  %s2130_s10 = int_to_ptr.vmem [resolvable:$true] %s280_s10 }
  0x5e   : > { %s1804_s8 = scalar_lea.hbm %s2124_s23, 4096  ;;  %p1806_p9 = pneg %p2126_p11 }
  0x5f   : > { %p1805_p7 = scmp.ne.s32.totalorder %s2124_s23, %s1804_s8  ;;  %s1809_s21 = scalar_lea.hbm %s2422_s0, 8192 }
  0x60   : > { %p1810_p1 = scmp.lt.u32.totalorder %s2124_s23, %s2422_s0  ;;  %p1811_p2 = scmp.lt.u32.totalorder %s1809_s21, %s1804_s8 }
  0x61   : > { %p1807_p12 = pnand %p1806_p9, %p1805_p7  ;;  %p1813_p8 = scmp.lt.u32.totalorder %s1804_s8, %s2124_s23 }
  0x62   : > { %p1812_p4 = por %p1811_p2, %p1810_p1 }
  0x63   : > { %p1808_p0 = pneg %p1807_p12 }
  0x64   : > { %p1814_p13 = por %p1813_p8, %p1812_p4 }
  0x66   : > { %p1815_p6 = pnand %p1814_p13, %p1808_p0 }
  0x68   : > { %1818 = shalt.err (!%p1815_p6)
}
  0x69   : > { %s1819_s20 = scalar_lea.vmem %s2130_s10, 4096  ;;  %s1915_s15 = smov [#allocation2]  }
  0x6a   : > { %p1820_p10 = scmp.ne.s32.totalorder %s2130_s10, %s1819_s20  ;;  %s1824_s29 = sshll.u32 %s1915_s15, 4  ;;  %s1825_s29 = int_to_ptr.vmem [resolvable:$false] %s1824_s29 }
  0x6b   : > { %s1826_s12 = scalar_lea.vmem %s1825_s29, 8192  ;;  %p1827_p12 = scmp.lt.s32.totalorder %s2130_s10, %s1825_s29 }
  0x6c   : > { %p1822_p3 = pnand %p1820_p10, %p1806_p9  ;;  %p1828_p1 = scmp.lt.s32.totalorder %s1826_s12, %s1819_s20 }
  0x6e   : > { %p1823_p7 = pneg %p1822_p3  ;;  %p1829_p2 = por %p1828_p1, %p1827_p12 }
  0x70   : > { %p1830_p4 = pnand %p1829_p2, %p1823_p7 }
  0x72   : > { %1833 = shalt.err (!%p1830_p4)
}
  0x73   : > { %s1916_s8 = smov 128   ;;  %s1917_s17 = smov 8  }
  0x74   : > { %1642 = dma.hbm_to_vmem [thread:$0]  (!%p2126_p11), %s2124_s23, 4096, %s2130_s10, %s2132_s14, %s1916_s8, %s1916_s8, %s1917_s17  }
  0x75   : > { %p2443_p9 = scmp.ne.s32.totalorder %s2437_s9, 0 }
  0x76   : > { %s2163_s21 = sand.u32 (!%p2443_p9), 1, %s1900_s25   ;;  %p2444_p0 = scmp.ne.s32.totalorder (!%p2443_p9), %s2434_s30, 0 }
  0x77   : > { %292 = sbr.rel (%p2443_p9) target bundleno = 899 (0x383), region = 48  ;;  %s1342_s16 = sshll.u32 (!%p2443_p9), %s2163_s21, 8 }
  0x78   : > { %s295_s13 = scalar_lea.sflag (!%p2443_p9), [#allocation3], %s2163_s21  ;;  %s2169_s20 = scalar_lea.vmem (!%p2443_p9), [#allocation2], %s1342_s16 }
  0x7e   : > { %1879 = dma.done.wait (%p2444_p0), %s295_s13, 4096  }
  0x7f   : > { %1881 = vsyncadd (%p2444_p0), %s295_s13, 4294963200  ;;  %p2445_p11 = scmp.eq.s32.totalorder %s1982_s28, 0 }
  0x81   : > { %1883 = dma.done.wait (%p2445_p11), [#allocation6], 2048   ;;  %p2446_p8 = pmov %p2445_p11 }
  0x83   : > { %1885 = vsyncadd (%p2446_p8), [#allocation6], 4294965248  ;;  %p2447_p13 = pmov %p2446_p8 }
  0x84   : > { %p2448_p6 = pmov %p2446_p8 }
  0x85   : > { %1887 = dma.done.wait (%p2447_p13), [#allocation9], 1024  }
  0x86   : > { %1889 = vsyncadd (%p2448_p6), [#allocation9], 4294966272  ;;  %v1696_v0 = vld [vmem:[#allocation5] sm:$0xff]   ;;  %v1697_v1 = vld [vmem:[#allocation5 + $0x8] sm:$0xff]   ;;  %s2307_s15 = scalar_lea.vmem [#allocation10], %s1342_s16  ;;  %s1380_s29 = sshll.u32 %s1982_s28, 12 }
  0x87   : > { %1453 = vmatprep.subr.bf16.mxu0 %v1696_v0  ;;  %1597 = vmatprep.subr.bf16.mxu1 %v1696_v0  ;;  %v1698_v2 = vld [vmem:[#allocation5 + $0x10] sm:$0xff]   ;;  %v1699_v3 = vld [vmem:[#allocation5 + $0x18] sm:$0xff]   ;;  %v344_v4 = vld [vmem:[%s2169_s20] sm:$0xff]  ;;  %s1230_s12 = sshll.u32 %s2307_s15, 4  ;;  %s2372_s16 = scalar_lea.hbm %s2429_s7, %s1380_s29  ;;  %s2374_s12 = int_to_ptr.vmem [resolvable:$true] %s1230_s12 }
  0x88   : > { %1454 = vmatpush3.bf16.msra.mxu0 %v1696_v0  ;;  %1605 = vmatpush3.bf16.msra.mxu1 %v1696_v0  ;;  %v345_v5 = vld [vmem:[%s2169_s20 + $0x8] sm:$0xff]  ;;  %v1700_v7 = vld [vmem:[#allocation5 + $0x20] sm:$0xff]   ;;  %v1702_v12 = vld [vmem:[#allocation5 + $0x30] sm:$0xff]   ;;  %s1217_s28 = scalar_lea.sflag [#allocation4], %s2163_s21  ;;  %s1834_s13 = scalar_lea.vmem %s2374_s12, 4096 }
  0x89   : > { %1455 = vmatprep.subr.bf16.mxu0 %v1697_v1  ;;  %1598 = vmatprep.subr.bf16.mxu1 %v1697_v1  ;;  %v376_v6 = vpack.c.bf16 %v345_v5, %v344_v4  ;;  %v360_v8 = vld [vmem:[%s2169_s20 + $0x80] sm:$0xff]  ;;  %v361_v9 = vld [vmem:[%s2169_s20 + $0x88] sm:$0xff]  ;;  %v1703_v13 = vld [vmem:[#allocation5 + $0x38] sm:$0xff]   ;;  %p1835_p10 = scmp.ne.s32.totalorder %s2374_s12, %s1834_s13 }
  0x8a   : > { %v384_v10 = vpack.c.bf16 %v361_v9, %v360_v8  ;;  %v1701_v11 = vld [vmem:[#allocation5 + $0x28] sm:$0xff]   ;;  %v346_v14 = vld [vmem:[%s2169_s20 + $0x10] sm:$0xff]  ;;  %v347_v15 = vld [vmem:[%s2169_s20 + $0x18] sm:$0xff] }
  0x8b   : > { %1469 = vmatprep.mubr.bf16.mxu0 %v376_v6  ;;  %v348_v16 = vld [vmem:[%s2169_s20 + $0x20] sm:$0xff]  ;;  %v349_v17 = vld [vmem:[%s2169_s20 + $0x28] sm:$0xff]  ;;  %v362_v18 = vld [vmem:[%s2169_s20 + $0x90] sm:$0xff]  ;;  %v377_v23 = vpack.c.bf16 %v347_v15, %v346_v14  ;;  %p1836_p3 = pnand %p1835_p10, %p2115_p5 }
  0x8c   : > { %1456 = vmatpush3.bf16.msra.mxu0 %v1697_v1  ;;  %1606 = vmatpush3.bf16.msra.mxu1 %v1697_v1  ;;  %v363_v19 = vld [vmem:[%s2169_s20 + $0x98] sm:$0xff]  ;;  %v364_v20 = vld [vmem:[%s2169_s20 + $0xa0] sm:$0xff]  ;;  %v365_v21 = vld [vmem:[%s2169_s20 + $0xa8] sm:$0xff]  ;;  %v378_v24 = vpack.c.bf16 %v349_v17, %v348_v16 }
  0x8d   : > { %1457 = vmatprep.subr.bf16.mxu0 %v1698_v2  ;;  %1599 = vmatprep.subr.bf16.mxu1 %v1698_v2  ;;  %v1704_v22 = vld [vmem:[#allocation7] sm:$0xff]   ;;  %v385_v25 = vpack.c.bf16 %v363_v19, %v362_v18  ;;  %v386_v26 = vpack.c.bf16 %v365_v21, %v364_v20  ;;  %v1705_v27 = vld [vmem:[#allocation7 + $0x8] sm:$0xff]   ;;  %v350_v28 = vld [vmem:[%s2169_s20 + $0x30] sm:$0xff]  ;;  %p1837_p7 = pneg %p1836_p3 }
  0x8e   : > { %1485 = vmatprep.mubr.bf16.mxu1 %v384_v10  ;;  %v351_v29 = vld [vmem:[%s2169_s20 + $0x38] sm:$0xff]  ;;  %v352_v30 = vld [vmem:[%s2169_s20 + $0x40] sm:$0xff]  ;;  %v353_v31 = vld [vmem:[%s2169_s20 + $0x48] sm:$0xff] }
  0x8f   : > { %v366_v32 = vld [vmem:[%s2169_s20 + $0xb0] sm:$0xff]  ;;  %v367_v33 = vld [vmem:[%s2169_s20 + $0xb8] sm:$0xff]  ;;  %v368_v34 = vld [vmem:[%s2169_s20 + $0xc0] sm:$0xff]  ;;  %v379_v37 = vpack.c.bf16 %v351_v29, %v350_v28  ;;  %v380_v38 = vpack.c.bf16 %v353_v31, %v352_v30 }
  0x90   : > { %1458 = vmatpush3.bf16.msra.mxu0 %v1698_v2  ;;  %1607 = vmatpush3.bf16.msra.mxu1 %v1698_v2  ;;  %v369_v35 = vld [vmem:[%s2169_s20 + $0xc8] sm:$0xff]  ;;  %v1706_v36 = vld [vmem:[#allocation7 + $0x10] sm:$0xff]   ;;  %v387_v39 = vpack.c.bf16 %v367_v33, %v366_v32  ;;  %v1707_v41 = vld [vmem:[#allocation7 + $0x18] sm:$0xff]  }
  0x91   : > { %1459 = vmatprep.subr.bf16.mxu0 %v1699_v3  ;;  %1600 = vmatprep.subr.bf16.mxu1 %v1699_v3  ;;  %v388_v40 = vpack.c.bf16 %v369_v35, %v368_v34  ;;  %v354_v42 = vld [vmem:[%s2169_s20 + $0x50] sm:$0xff]  ;;  %v355_v43 = vld [vmem:[%s2169_s20 + $0x58] sm:$0xff]  ;;  %v356_v44 = vld [vmem:[%s2169_s20 + $0x60] sm:$0xff] }
  0x92   : > { %v357_v45 = vld [vmem:[%s2169_s20 + $0x68] sm:$0xff]  ;;  %v370_v46 = vld [vmem:[%s2169_s20 + $0xd0] sm:$0xff]  ;;  %v371_v47 = vld [vmem:[%s2169_s20 + $0xd8] sm:$0xff]  ;;  %v381_v51 = vpack.c.bf16 %v355_v43, %v354_v42 }
  0x93   : > { %v372_v48 = vld [vmem:[%s2169_s20 + $0xe0] sm:$0xff]  ;;  %v373_v49 = vld [vmem:[%s2169_s20 + $0xe8] sm:$0xff]  ;;  %v382_v52 = vpack.c.bf16 %v357_v45, %v356_v44  ;;  %v389_v53 = vpack.c.bf16 %v371_v47, %v370_v46  ;;  %v358_v56 = vld [vmem:[%s2169_s20 + $0x70] sm:$0xff] }
  0x94   : > { %1460 = vmatpush3.bf16.msra.mxu0 %v1699_v3  ;;  %1608 = vmatpush3.bf16.msra.mxu1 %v1699_v3  ;;  %v1708_v50 = vld [vmem:[#allocation7 + $0x20] sm:$0xff]   ;;  %v390_v54 = vpack.c.bf16 %v373_v49, %v372_v48  ;;  %v1709_v55 = vld [vmem:[#allocation7 + $0x28] sm:$0xff]   ;;  %v359_v57 = vld [vmem:[%s2169_s20 + $0x78] sm:$0xff] }
  0x95   : > { %1461 = vmatprep.subr.bf16.mxu0 %v1700_v7  ;;  %1601 = vmatprep.subr.bf16.mxu1 %v1700_v7  ;;  %v374_v58 = vld [vmem:[%s2169_s20 + $0xf0] sm:$0xff]  ;;  %v375_v59 = vld [vmem:[%s2169_s20 + $0xf8] sm:$0xff]  ;;  %v383_v60 = vpack.c.bf16 %v359_v57, %v358_v56  ;;  %v1712_v0 = vld [vmem:[#allocation8] sm:$0xff]   ;;  %s1918_s20 = smov [#allocation10]  }
  0x96   : > { %v391_v61 = vpack.c.bf16 %v375_v59, %v374_v58  ;;  %v1710_v62 = vld [vmem:[#allocation7 + $0x30] sm:$0xff]   ;;  %v1711_v63 = vld [vmem:[#allocation7 + $0x38] sm:$0xff]   ;;  %v1713_v1 = vld [vmem:[#allocation8 + $0x8] sm:$0xff]   ;;  %s1838_s30 = sshll.u32 %s1918_s20, 4  ;;  %s1839_s30 = int_to_ptr.vmem [resolvable:$false] %s1838_s30 }
  0x97   : > { %v1714_v2 = vld [vmem:[#allocation8 + $0x10] sm:$0xff]   ;;  %v1715_v3 = vld [vmem:[#allocation8 + $0x18] sm:$0xff]   ;;  %v1716_v4 = vld [vmem:[#allocation8 + $0x20] sm:$0xff]   ;;  %s1840_s9 = scalar_lea.vmem %s1839_s30, 8192  ;;  %p1841_p12 = scmp.lt.s32.totalorder %s2374_s12, %s1839_s30 }
  0x98   : > { %1462 = vmatpush3.bf16.msra.mxu0 %v1700_v7  ;;  %1609 = vmatpush3.bf16.msra.mxu1 %v1700_v7  ;;  %v1717_v5 = vld [vmem:[#allocation8 + $0x28] sm:$0xff]   ;;  %v2218_v6 = vld [vmem:[%s2424_s2] ss:$0 sm:$0xff]  ;;  %p1842_p1 = scmp.lt.s32.totalorder %s1840_s9, %s1834_s13 }
  0x99   : > { %1463 = vmatprep.subr.bf16.mxu0 %v1701_v11  ;;  %1602 = vmatprep.subr.bf16.mxu1 %v1701_v11 }
  0x9a   : > { %p1843_p2 = por %p1842_p1, %p1841_p12 }
  0x9c   : > { %1464 = vmatpush3.bf16.msra.mxu0 %v1701_v11  ;;  %1610 = vmatpush3.bf16.msra.mxu1 %v1701_v11  ;;  %p1844_p4 = pnand %p1843_p2, %p1837_p7 }
  0x9d   : > { %1465 = vmatprep.subr.bf16.mxu0 %v1702_v12  ;;  %1603 = vmatprep.subr.bf16.mxu1 %v1702_v12 }
  0xa0   : > { %1466 = vmatpush3.bf16.msra.mxu0 %v1702_v12  ;;  %1611 = vmatpush3.bf16.msra.mxu1 %v1702_v12 }
  0xa1   : > { %1467 = vmatprep.subr.bf16.mxu0 %v1703_v13  ;;  %1604 = vmatprep.subr.bf16.mxu1 %v1703_v13 }
  0xa4   : > { %1468 = vmatpush3.bf16.msra.mxu0 %v1703_v13  ;;  %1612 = vmatpush3.bf16.msra.mxu1 %v1703_v13 }
  0xa5   : > { %1501 = vmatprep.subr.bf16.mxu1 %v1704_v22  ;;  %1549 = vmatprep.subr.bf16.mxu0 %v1712_v0 }
  0xa7   : > { %1470 = vmatmul.mubr.bf16.vlgmr.msra.gmra.mrb[0].mxu0 %v377_v23  ;;  %1486 = vmatmul.mubr.bf16.vlgmr.msra.gmra.mrb[0].mxu1 %v385_v25 }
  0xa8   : > { %1473 = vmatprep.mubr.bf16.mxu0 %v378_v24  ;;  %1489 = vmatprep.mubr.bf16.mxu1 %v386_v26 }
  0xa9   : > { %1502 = vmatpush3.bf16.msra.mxu1 %v1704_v22  ;;  %1550 = vmatpush3.bf16.msra.mxu0 %v1712_v0 }
  0xaa   : > { %1503 = vmatprep.subr.bf16.mxu1 %v1705_v27  ;;  %1551 = vmatprep.subr.bf16.mxu0 %v1713_v1 }
  0xad   : > { %1504 = vmatpush3.bf16.msra.mxu1 %v1705_v27  ;;  %1552 = vmatpush3.bf16.msra.mxu0 %v1713_v1 }
  0xae   : > { %1505 = vmatprep.subr.bf16.mxu1 %v1706_v36  ;;  %1553 = vmatprep.subr.bf16.mxu0 %v1714_v2 }
  0xaf   : > { %1474 = vmatmul.mubr.bf16.gmra.mrb[4].mxu0 %v379_v37  ;;  %1490 = vmatmul.mubr.bf16.gmra.mrb[4].mxu1 %v387_v39 }
  0xb0   : > { %1477 = vmatprep.mubr.bf16.mxu0 %v380_v38  ;;  %1493 = vmatprep.mubr.bf16.mxu1 %v388_v40 }
  0xb1   : > { %1506 = vmatpush3.bf16.msra.mxu1 %v1706_v36  ;;  %1554 = vmatpush3.bf16.msra.mxu0 %v1714_v2 }
  0xb2   : > { %1507 = vmatprep.subr.bf16.mxu1 %v1707_v41  ;;  %1555 = vmatprep.subr.bf16.mxu0 %v1715_v3 }
  0xb5   : > { %1508 = vmatpush3.bf16.msra.mxu1 %v1707_v41  ;;  %1556 = vmatpush3.bf16.msra.mxu0 %v1715_v3 }
  0xb6   : > { %1509 = vmatprep.subr.bf16.mxu1 %v1708_v50  ;;  %1557 = vmatprep.subr.bf16.mxu0 %v1716_v4 }
  0xb7   : > { %1478 = vmatmul.mubr.bf16.gmra.mrb[8].mxu0 %v381_v51  ;;  %1494 = vmatmul.mubr.bf16.gmra.mrb[8].mxu1 %v389_v53 }
  0xb8   : > { %1481 = vmatprep.mubr.bf16.mxu0 %v382_v52  ;;  %1497 = vmatprep.mubr.bf16.mxu1 %v390_v54 }
  0xb9   : > { %1510 = vmatpush3.bf16.msra.mxu1 %v1708_v50  ;;  %1558 = vmatpush3.bf16.msra.mxu0 %v1716_v4 }
  0xba   : > { %1511 = vmatprep.subr.bf16.mxu1 %v1709_v55  ;;  %1559 = vmatprep.subr.bf16.mxu0 %v1717_v5 }
  0xbd   : > { %1512 = vmatpush3.bf16.msra.mxu1 %v1709_v55  ;;  %1560 = vmatpush3.bf16.msra.mxu0 %v1717_v5 }
  0xbe   : > { %1513 = vmatprep.subr.bf16.mxu1 %v1710_v62 }
  0xbf   : > { %1482 = vmatmul.mubr.bf16.gmra.mrb[12].mxu0 %v383_v60  ;;  %1498 = vmatmul.mubr.bf16.gmra.mrb[12].mxu1 %v391_v61 }
  0xc1   : > { %1514 = vmatpush3.bf16.msra.mxu1 %v1710_v62 }
  0xc2   : > { %1515 = vmatprep.subr.bf16.mxu1 %v1711_v63 }
  0xc5   : > { %1516 = vmatpush3.bf16.msra.mxu1 %v1711_v63 }
 0x17a   : > { %v1471_v7 = vpop.f32.mrb[0].mxu0  ;;  %v1487_v10 = vpop.f32.mrb[0].mxu1 }
 0x17b   : > { %v506_v8 = vadd.f32 %v1471_v7, %v2218_v6  ;;  %v497_v9 = vpop.f32.mrb[1].mxu0  ;;  %v570_v13 = vadd.f32 %v1487_v10, %v2218_v6  ;;  %v561_v14 = vpop.f32.mrb[1].mxu1 }
 0x17c   : > { %v498_v11 = vadd.f32 %v2218_v6, %v497_v9  ;;  %v1472_v12 = vpop.f32.mrb[2].mxu0  ;;  %v562_v17 = vadd.f32 %v2218_v6, %v561_v14  ;;  %v1488_v18 = vpop.f32.mrb[2].mxu1 }
 0x17d   : > { %v509_v15 = vadd.f32 %v1472_v12, %v2218_v6  ;;  %v500_v16 = vpop.f32.mrb[3].mxu0  ;;  %v642_v20 = vmax.f32 %v570_v13, 0.0  ;;  %v573_v21 = vadd.f32 %v1488_v18, %v2218_v6  ;;  %v564_v22 = vpop.f32.mrb[3].mxu1  ;;  %v626_v23 = vmax.f32 %v506_v8, 0.0 }
 0x17e   : > { %v501_v19 = vadd.f32 %v2218_v6, %v500_v16  ;;  %v640_v25 = vmax.f32 %v562_v17, 0.0  ;;  %v565_v26 = vadd.f32 %v2218_v6, %v564_v22  ;;  %v624_v27 = vmax.f32 %v498_v11, 0.0 }
 0x17f   : > { %v627_v24 = vmax.f32 %v509_v15, 0.0  ;;  %v643_v29 = vmax.f32 %v573_v21, 0.0 }
 0x180   : > { %v625_v28 = vmax.f32 %v501_v19, 0.0  ;;  %v641_v31 = vmax.f32 %v565_v26, 0.0 }
 0x181   : > { %v657_v30 = vpack.c.bf16 %v627_v24, %v626_v23  ;;  %v2228_v34 = vpack.c.bf16 %v643_v29, %v642_v20 }
 0x182   : > { %v656_v32 = vpack.c.bf16 %v625_v28, %v624_v27  ;;  %v1475_v33 = vpop.f32.mrb[4].mxu0  ;;  %v2231_v37 = vpack.c.bf16 %v641_v31, %v640_v25  ;;  %v1491_v38 = vpop.f32.mrb[4].mxu1 }
 0x183   : > { %v522_v35 = vadd.f32 %v1475_v33, %v2218_v6  ;;  %v513_v36 = vpop.f32.mrb[5].mxu0  ;;  %v586_v41 = vadd.f32 %v1491_v38, %v2218_v6  ;;  %v577_v42 = vpop.f32.mrb[5].mxu1 }
 0x184   : > { %v514_v39 = vadd.f32 %v2218_v6, %v513_v36  ;;  %v1476_v40 = vpop.f32.mrb[6].mxu0  ;;  %1517 = vmatprep.mubr.bf16.mxu1 %v656_v32  ;;  %v578_v45 = vadd.f32 %v2218_v6, %v577_v42  ;;  %v1492_v46 = vpop.f32.mrb[6].mxu1 }
 0x185   : > { %v525_v43 = vadd.f32 %v1476_v40, %v2218_v6  ;;  %v516_v44 = vpop.f32.mrb[7].mxu0  ;;  %1518 = vmatmul.mubr.bf16.vlgmr.msra.gmra.mrb[16].mxu1 %v657_v30  ;;  %v646_v48 = vmax.f32 %v586_v41, 0.0  ;;  %v589_v49 = vadd.f32 %v1492_v46, %v2218_v6  ;;  %v580_v50 = vpop.f32.mrb[7].mxu1  ;;  %v630_v51 = vmax.f32 %v522_v35, 0.0 }
 0x186   : > { %v517_v47 = vadd.f32 %v2218_v6, %v516_v44  ;;  %v644_v53 = vmax.f32 %v578_v45, 0.0  ;;  %v581_v54 = vadd.f32 %v2218_v6, %v580_v50  ;;  %v628_v55 = vmax.f32 %v514_v39, 0.0 }
 0x187   : > { %v631_v52 = vmax.f32 %v525_v43, 0.0  ;;  %v647_v57 = vmax.f32 %v589_v49, 0.0 }
 0x188   : > { %v629_v56 = vmax.f32 %v517_v47, 0.0  ;;  %v645_v59 = vmax.f32 %v581_v54, 0.0 }
 0x189   : > { %v659_v58 = vpack.c.bf16 %v631_v52, %v630_v51  ;;  %v2240_v62 = vpack.c.bf16 %v647_v57, %v646_v48 }
 0x18a   : > { %v658_v60 = vpack.c.bf16 %v629_v56, %v628_v55  ;;  %v1479_v61 = vpop.f32.mrb[8].mxu0  ;;  %v666_v1 = vpack.c.bf16 %v645_v59, %v644_v53  ;;  %v1495_v2 = vpop.f32.mrb[8].mxu1  ;;  %v2264_v59 = vld [vmem:[%s2426_s4] ss:$0 sm:$0xff] }
 0x18b   : > { %v538_v63 = vadd.f32 %v1479_v61, %v2218_v6  ;;  %v529_v0 = vpop.f32.mrb[9].mxu0  ;;  %v602_v5 = vadd.f32 %v1495_v2, %v2218_v6  ;;  %v593_v7 = vpop.f32.mrb[9].mxu1 }
 0x18c   : > { %v530_v3 = vadd.f32 %v2218_v6, %v529_v0  ;;  %v1480_v4 = vpop.f32.mrb[10].mxu0  ;;  %1521 = vmatprep.mubr.bf16.mxu1 %v658_v60  ;;  %v594_v10 = vadd.f32 %v2218_v6, %v593_v7  ;;  %v1496_v11 = vpop.f32.mrb[10].mxu1 }
 0x18d   : > { %v541_v8 = vadd.f32 %v1480_v4, %v2218_v6  ;;  %v532_v9 = vpop.f32.mrb[11].mxu0  ;;  %1522 = vmatmul.mubr.bf16.gmra.mrb[20].mxu1 %v659_v58  ;;  %v650_v13 = vmax.f32 %v602_v5, 0.0  ;;  %v605_v14 = vadd.f32 %v1496_v11, %v2218_v6  ;;  %v596_v15 = vpop.f32.mrb[11].mxu1  ;;  %v634_v16 = vmax.f32 %v538_v63, 0.0  ;;  %v1719_v58 = vld [vmem:[#allocation8 + $0x38] sm:$0xff]  }
 0x18e   : > { %v533_v12 = vadd.f32 %v2218_v6, %v532_v9  ;;  %v648_v18 = vmax.f32 %v594_v10, 0.0  ;;  %v597_v19 = vadd.f32 %v2218_v6, %v596_v15  ;;  %v632_v20 = vmax.f32 %v530_v3, 0.0 }
 0x18f   : > { %v635_v17 = vmax.f32 %v541_v8, 0.0  ;;  %v651_v22 = vmax.f32 %v605_v14, 0.0 }
 0x190   : > { %v633_v21 = vmax.f32 %v533_v12, 0.0  ;;  %v649_v24 = vmax.f32 %v597_v19, 0.0 }
 0x191   : > { %v661_v23 = vpack.c.bf16 %v635_v17, %v634_v16  ;;  %v669_v27 = vpack.c.bf16 %v651_v22, %v650_v13 }
 0x192   : > { %v660_v25 = vpack.c.bf16 %v633_v21, %v632_v20  ;;  %v1483_v26 = vpop.f32.mrb[12].mxu0  ;;  %v668_v30 = vpack.c.bf16 %v649_v24, %v648_v18  ;;  %v1499_v31 = vpop.f32.mrb[12].mxu1 }
 0x193   : > { %v554_v28 = vadd.f32 %v1483_v26, %v2218_v6  ;;  %v545_v29 = vpop.f32.mrb[13].mxu0  ;;  %v618_v35 = vadd.f32 %v1499_v31, %v2218_v6  ;;  %v609_v36 = vpop.f32.mrb[13].mxu1 }
 0x194   : > { %v546_v32 = vadd.f32 %v2218_v6, %v545_v29  ;;  %v1484_v33 = vpop.f32.mrb[14].mxu0  ;;  %1525 = vmatprep.mubr.bf16.mxu1 %v660_v25  ;;  %v610_v40 = vadd.f32 %v2218_v6, %v609_v36  ;;  %v1500_v41 = vpop.f32.mrb[14].mxu1 }
 0x195   : > { %v557_v38 = vadd.f32 %v1484_v33, %v2218_v6  ;;  %v548_v39 = vpop.f32.mrb[15].mxu0  ;;  %1526 = vmatmul.mubr.bf16.gmra.mrb[24].mxu1 %v661_v23  ;;  %v654_v43 = vmax.f32 %v618_v35, 0.0  ;;  %v621_v44 = vadd.f32 %v1500_v41, %v2218_v6  ;;  %v612_v45 = vpop.f32.mrb[15].mxu1  ;;  %v638_v46 = vmax.f32 %v554_v28, 0.0 }
 0x196   : > { %v549_v42 = vadd.f32 %v2218_v6, %v548_v39  ;;  %v652_v48 = vmax.f32 %v610_v40, 0.0  ;;  %v613_v49 = vadd.f32 %v2218_v6, %v612_v45  ;;  %v636_v50 = vmax.f32 %v546_v32, 0.0  ;;  %v1718_v6 = vld [vmem:[#allocation8 + $0x30] sm:$0xff]  }
 0x197   : > { %v639_v47 = vmax.f32 %v557_v38, 0.0  ;;  %v655_v52 = vmax.f32 %v621_v44, 0.0  ;;  %1561 = vmatprep.subr.bf16.mxu0 %v1718_v6 }
 0x198   : > { %v637_v51 = vmax.f32 %v549_v42, 0.0  ;;  %v653_v54 = vmax.f32 %v613_v49, 0.0  ;;  %1562 = vmatpush3.bf16.msra.mxu0 %v1718_v6 }
 0x199   : > { %v663_v53 = vpack.c.bf16 %v639_v47, %v638_v46  ;;  %v671_v56 = vpack.c.bf16 %v655_v52, %v654_v43  ;;  %1563 = vmatprep.subr.bf16.mxu0 %v1719_v58 }
 0x19a   : > { %v662_v55 = vpack.c.bf16 %v637_v51, %v636_v50  ;;  %v670_v57 = vpack.c.bf16 %v653_v54, %v652_v48 }
 0x19c   : > { %1529 = vmatprep.mubr.bf16.mxu1 %v662_v55  ;;  %1564 = vmatpush3.bf16.msra.mxu0 %v1719_v58 }
 0x19d   : > { %1530 = vmatmul.mubr.bf16.gmra.mrb[28].mxu1 %v663_v53 }
 0x19e   : > { %1533 = vmatprep.mubr.bf16.mxu1 %v2231_v37 }
 0x1a5   : > { %1534 = vmatmul.mubr.bf16.gmra.mrb[32].mxu1 %v2228_v34 }
 0x1a6   : > { %1537 = vmatprep.mubr.bf16.mxu1 %v666_v1 }
 0x1ad   : > { %1538 = vmatmul.mubr.bf16.gmra.mrb[36].mxu1 %v2240_v62 }
 0x1ae   : > { %1541 = vmatprep.mubr.bf16.mxu1 %v668_v30 }
 0x1b5   : > { %1542 = vmatmul.mubr.bf16.gmra.mrb[40].mxu1 %v669_v27 }
 0x1b6   : > { %1545 = vmatprep.mubr.bf16.mxu1 %v670_v57 }
 0x1bd   : > { %1546 = vmatmul.mubr.bf16.gmra.mrb[44].mxu1 %v671_v56 }
 0x258   : > { %v1519_v37 = vpop.f32.mrb[16].mxu1 }
 0x259   : > { %v786_v34 = vadd.f32 %v1519_v37, %v2264_v59  ;;  %v777_v60 = vpop.f32.mrb[17].mxu1 }
 0x25a   : > { %v778_v61 = vadd.f32 %v2264_v59, %v777_v60  ;;  %v1520_v62 = vpop.f32.mrb[18].mxu1 }
 0x25b   : > { %v789_v63 = vadd.f32 %v1520_v62, %v2264_v59  ;;  %v780_v0 = vpop.f32.mrb[19].mxu1  ;;  %v906_v2 = vmax.f32 %v786_v34, 0.0 }
 0x25c   : > { %v781_v1 = vadd.f32 %v2264_v59, %v780_v0  ;;  %v904_v4 = vmax.f32 %v778_v61, 0.0 }
 0x25d   : > { %v907_v3 = vmax.f32 %v789_v63, 0.0 }
 0x25e   : > { %v905_v5 = vmax.f32 %v781_v1, 0.0 }
 0x25f   : > { %v937_v7 = vpack.c.bf16 %v907_v3, %v906_v2 }
 0x260   : > { %v936_v8 = vpack.c.bf16 %v905_v5, %v904_v4  ;;  %v1523_v9 = vpop.f32.mrb[20].mxu1 }
 0x261   : > { %v802_v10 = vadd.f32 %v1523_v9, %v2264_v59  ;;  %v793_v11 = vpop.f32.mrb[21].mxu1 }
 0x262   : > { %v794_v12 = vadd.f32 %v2264_v59, %v793_v11  ;;  %v1524_v13 = vpop.f32.mrb[22].mxu1  ;;  %1565 = vmatprep.mubr.bf16.mxu0 %v936_v8 }
 0x263   : > { %v805_v14 = vadd.f32 %v1524_v13, %v2264_v59  ;;  %v796_v15 = vpop.f32.mrb[23].mxu1  ;;  %1566 = vmatmul.mubr.bf16.vlgmr.msra.gmra.mrb[16].mxu0 %v937_v7  ;;  %v910_v17 = vmax.f32 %v802_v10, 0.0 }
 0x264   : > { %v797_v16 = vadd.f32 %v2264_v59, %v796_v15  ;;  %v908_v19 = vmax.f32 %v794_v12, 0.0 }
 0x265   : > { %v911_v18 = vmax.f32 %v805_v14, 0.0 }
 0x266   : > { %v909_v20 = vmax.f32 %v797_v16, 0.0 }
 0x267   : > { %v939_v21 = vpack.c.bf16 %v911_v18, %v910_v17 }
 0x268   : > { %v938_v22 = vpack.c.bf16 %v909_v20, %v908_v19  ;;  %v1527_v23 = vpop.f32.mrb[24].mxu1 }
 0x269   : > { %v818_v24 = vadd.f32 %v1527_v23, %v2264_v59  ;;  %v809_v25 = vpop.f32.mrb[25].mxu1 }
 0x26a   : > { %v810_v26 = vadd.f32 %v2264_v59, %v809_v25  ;;  %v1528_v27 = vpop.f32.mrb[26].mxu1  ;;  %1569 = vmatprep.mubr.bf16.mxu0 %v938_v22 }
 0x26b   : > { %v821_v28 = vadd.f32 %v1528_v27, %v2264_v59  ;;  %v812_v29 = vpop.f32.mrb[27].mxu1  ;;  %1570 = vmatmul.mubr.bf16.gmra.mrb[20].mxu0 %v939_v21  ;;  %v914_v31 = vmax.f32 %v818_v24, 0.0 }
 0x26c   : > { %v813_v30 = vadd.f32 %v2264_v59, %v812_v29  ;;  %v912_v33 = vmax.f32 %v810_v26, 0.0 }
 0x26d   : > { %v915_v32 = vmax.f32 %v821_v28, 0.0 }
 0x26e   : > { %v913_v35 = vmax.f32 %v813_v30, 0.0 }
 0x26f   : > { %v941_v36 = vpack.c.bf16 %v915_v32, %v914_v31 }
 0x270   : > { %v940_v38 = vpack.c.bf16 %v913_v35, %v912_v33  ;;  %v1531_v39 = vpop.f32.mrb[28].mxu1 }
 0x271   : > { %v834_v40 = vadd.f32 %v1531_v39, %v2264_v59  ;;  %v825_v41 = vpop.f32.mrb[29].mxu1 }
 0x272   : > { %v826_v42 = vadd.f32 %v2264_v59, %v825_v41  ;;  %v1532_v43 = vpop.f32.mrb[30].mxu1  ;;  %1573 = vmatprep.mubr.bf16.mxu0 %v940_v38 }
 0x273   : > { %v837_v44 = vadd.f32 %v1532_v43, %v2264_v59  ;;  %v828_v45 = vpop.f32.mrb[31].mxu1  ;;  %1574 = vmatmul.mubr.bf16.gmra.mrb[24].mxu0 %v941_v36  ;;  %v918_v47 = vmax.f32 %v834_v40, 0.0 }
 0x274   : > { %v829_v46 = vadd.f32 %v2264_v59, %v828_v45  ;;  %v916_v49 = vmax.f32 %v826_v42, 0.0 }
 0x275   : > { %v919_v48 = vmax.f32 %v837_v44, 0.0 }
 0x276   : > { %v917_v50 = vmax.f32 %v829_v46, 0.0  ;;  %v2301_v46 = vld [vmem:[%s2428_s6] ss:$0 sm:$0xff] }
 0x277   : > { %v943_v51 = vpack.c.bf16 %v919_v48, %v918_v47 }
 0x278   : > { %v942_v52 = vpack.c.bf16 %v917_v50, %v916_v49  ;;  %v1535_v53 = vpop.f32.mrb[32].mxu1 }
 0x279   : > { %v850_v54 = vadd.f32 %v1535_v53, %v2264_v59  ;;  %v841_v55 = vpop.f32.mrb[33].mxu1 }
 0x27a   : > { %v842_v56 = vadd.f32 %v2264_v59, %v841_v55  ;;  %v1536_v57 = vpop.f32.mrb[34].mxu1  ;;  %1577 = vmatprep.mubr.bf16.mxu0 %v942_v52 }
 0x27b   : > { %v853_v6 = vadd.f32 %v1536_v57, %v2264_v59  ;;  %v844_v58 = vpop.f32.mrb[35].mxu1  ;;  %1578 = vmatmul.mubr.bf16.gmra.mrb[28].mxu0 %v943_v51  ;;  %v922_v34 = vmax.f32 %v850_v54, 0.0 }
 0x27c   : > { %v845_v37 = vadd.f32 %v2264_v59, %v844_v58  ;;  %v920_v61 = vmax.f32 %v842_v56, 0.0 }
 0x27d   : > { %v923_v60 = vmax.f32 %v853_v6, 0.0 }
 0x27e   : > { %v921_v62 = vmax.f32 %v845_v37, 0.0 }
 0x27f   : > { %v945_v63 = vpack.c.bf16 %v923_v60, %v922_v34 }
 0x280   : > { %v944_v0 = vpack.c.bf16 %v921_v62, %v920_v61  ;;  %v1539_v1 = vpop.f32.mrb[36].mxu1 }
 0x281   : > { %v866_v2 = vadd.f32 %v1539_v1, %v2264_v59  ;;  %v857_v3 = vpop.f32.mrb[37].mxu1 }
 0x282   : > { %v858_v4 = vadd.f32 %v2264_v59, %v857_v3  ;;  %v1540_v5 = vpop.f32.mrb[38].mxu1  ;;  %1581 = vmatprep.mubr.bf16.mxu0 %v944_v0 }
 0x283   : > { %v869_v7 = vadd.f32 %v1540_v5, %v2264_v59  ;;  %v860_v8 = vpop.f32.mrb[39].mxu1  ;;  %1582 = vmatmul.mubr.bf16.gmra.mrb[32].mxu0 %v945_v63  ;;  %v926_v10 = vmax.f32 %v866_v2, 0.0 }
 0x284   : > { %v861_v9 = vadd.f32 %v2264_v59, %v860_v8  ;;  %v924_v12 = vmax.f32 %v858_v4, 0.0 }
 0x285   : > { %v927_v11 = vmax.f32 %v869_v7, 0.0 }
 0x286   : > { %v925_v13 = vmax.f32 %v861_v9, 0.0 }
 0x287   : > { %v947_v14 = vpack.c.bf16 %v927_v11, %v926_v10 }
 0x288   : > { %v946_v15 = vpack.c.bf16 %v925_v13, %v924_v12  ;;  %v1543_v16 = vpop.f32.mrb[40].mxu1 }
 0x289   : > { %v882_v17 = vadd.f32 %v1543_v16, %v2264_v59  ;;  %v873_v18 = vpop.f32.mrb[41].mxu1 }
 0x28a   : > { %v874_v19 = vadd.f32 %v2264_v59, %v873_v18  ;;  %v1544_v20 = vpop.f32.mrb[42].mxu1  ;;  %1585 = vmatprep.mubr.bf16.mxu0 %v946_v15 }
 0x28b   : > { %v885_v21 = vadd.f32 %v1544_v20, %v2264_v59  ;;  %v876_v22 = vpop.f32.mrb[43].mxu1  ;;  %1586 = vmatmul.mubr.bf16.gmra.mrb[36].mxu0 %v947_v14  ;;  %v930_v24 = vmax.f32 %v882_v17, 0.0 }
 0x28c   : > { %v877_v23 = vadd.f32 %v2264_v59, %v876_v22  ;;  %v928_v26 = vmax.f32 %v874_v19, 0.0 }
 0x28d   : > { %v931_v25 = vmax.f32 %v885_v21, 0.0 }
 0x28e   : > { %v929_v27 = vmax.f32 %v877_v23, 0.0 }
 0x28f   : > { %v949_v28 = vpack.c.bf16 %v931_v25, %v930_v24 }
 0x290   : > { %v948_v29 = vpack.c.bf16 %v929_v27, %v928_v26  ;;  %v1547_v30 = vpop.f32.mrb[44].mxu1 }
 0x291   : > { %v898_v31 = vadd.f32 %v1547_v30, %v2264_v59  ;;  %v889_v32 = vpop.f32.mrb[45].mxu1 }
 0x292   : > { %v890_v33 = vadd.f32 %v2264_v59, %v889_v32  ;;  %v1548_v35 = vpop.f32.mrb[46].mxu1  ;;  %1589 = vmatprep.mubr.bf16.mxu0 %v948_v29 }
 0x293   : > { %v901_v36 = vadd.f32 %v1548_v35, %v2264_v59  ;;  %v892_v38 = vpop.f32.mrb[47].mxu1  ;;  %1590 = vmatmul.mubr.bf16.gmra.mrb[40].mxu0 %v949_v28  ;;  %v934_v40 = vmax.f32 %v898_v31, 0.0 }
 0x294   : > { %v893_v39 = vadd.f32 %v2264_v59, %v892_v38  ;;  %v932_v42 = vmax.f32 %v890_v33, 0.0 }
 0x295   : > { %v935_v41 = vmax.f32 %v901_v36, 0.0 }
 0x296   : > { %v933_v43 = vmax.f32 %v893_v39, 0.0 }
 0x297   : > { %v951_v44 = vpack.c.bf16 %v935_v41, %v934_v40 }
 0x298   : > { %v950_v45 = vpack.c.bf16 %v933_v43, %v932_v42 }
 0x29a   : > { %1593 = vmatprep.mubr.bf16.mxu0 %v950_v45 }
 0x29b   : > { %1594 = vmatmul.mubr.bf16.gmra.mrb[44].mxu0 %v951_v44 }
 0x336   : > { %v1567_v47 = vpop.f32.mrb[16].mxu0 }
 0x337   : > { %v1066_v48 = vadd.f32 %v1567_v47, %v2301_v46  ;;  %v1057_v49 = vpop.f32.mrb[17].mxu0 }
 0x338   : > { %v1058_v50 = vadd.f32 %v2301_v46, %v1057_v49  ;;  %v1568_v59 = vpop.f32.mrb[18].mxu0 }
 0x339   : > { %1186 = vst [vmem:[%s2307_s15 + $0x10] sm:$0xff] %v1066_v48  ;;  %v1069_v51 = vadd.f32 %v1568_v59, %v2301_v46  ;;  %v1060_v52 = vpop.f32.mrb[19].mxu0 }
 0x33a   : > { %1184 = vst [vmem:[%s2307_s15] sm:$0xff] %v1058_v50  ;;  %v1061_v53 = vadd.f32 %v2301_v46, %v1060_v52 }
 0x33b   : > { %1187 = vst [vmem:[%s2307_s15 + $0x18] sm:$0xff] %v1069_v51 }
 0x33c   : > { %1185 = vst [vmem:[%s2307_s15 + $0x8] sm:$0xff] %v1061_v53 }
 0x33e   : > { %v1571_v54 = vpop.f32.mrb[20].mxu0 }
 0x33f   : > { %v1082_v55 = vadd.f32 %v1571_v54, %v2301_v46  ;;  %v1073_v56 = vpop.f32.mrb[21].mxu0 }
 0x340   : > { %v1074_v57 = vadd.f32 %v2301_v46, %v1073_v56  ;;  %v1572_v6 = vpop.f32.mrb[22].mxu0 }
 0x341   : > { %1190 = vst [vmem:[%s2307_s15 + $0x30] sm:$0xff] %v1082_v55  ;;  %v1085_v58 = vadd.f32 %v1572_v6, %v2301_v46  ;;  %v1076_v37 = vpop.f32.mrb[23].mxu0 }
 0x342   : > { %1188 = vst [vmem:[%s2307_s15 + $0x20] sm:$0xff] %v1074_v57  ;;  %v1077_v34 = vadd.f32 %v2301_v46, %v1076_v37 }
 0x343   : > { %1191 = vst [vmem:[%s2307_s15 + $0x38] sm:$0xff] %v1085_v58 }
 0x344   : > { %1189 = vst [vmem:[%s2307_s15 + $0x28] sm:$0xff] %v1077_v34 }
 0x346   : > { %v1575_v60 = vpop.f32.mrb[24].mxu0 }
 0x347   : > { %v1098_v61 = vadd.f32 %v1575_v60, %v2301_v46  ;;  %v1089_v62 = vpop.f32.mrb[25].mxu0 }
 0x348   : > { %v1090_v63 = vadd.f32 %v2301_v46, %v1089_v62  ;;  %v1576_v0 = vpop.f32.mrb[26].mxu0 }
 0x349   : > { %1194 = vst [vmem:[%s2307_s15 + $0x50] sm:$0xff] %v1098_v61  ;;  %v1101_v1 = vadd.f32 %v1576_v0, %v2301_v46  ;;  %v1092_v2 = vpop.f32.mrb[27].mxu0 }
 0x34a   : > { %1192 = vst [vmem:[%s2307_s15 + $0x40] sm:$0xff] %v1090_v63  ;;  %v1093_v3 = vadd.f32 %v2301_v46, %v1092_v2 }
 0x34b   : > { %1195 = vst [vmem:[%s2307_s15 + $0x58] sm:$0xff] %v1101_v1 }
 0x34c   : > { %1193 = vst [vmem:[%s2307_s15 + $0x48] sm:$0xff] %v1093_v3 }
 0x34e   : > { %v1579_v4 = vpop.f32.mrb[28].mxu0 }
 0x34f   : > { %v1114_v5 = vadd.f32 %v1579_v4, %v2301_v46  ;;  %v1105_v7 = vpop.f32.mrb[29].mxu0 }
 0x350   : > { %v1106_v8 = vadd.f32 %v2301_v46, %v1105_v7  ;;  %v1580_v9 = vpop.f32.mrb[30].mxu0 }
 0x351   : > { %1198 = vst [vmem:[%s2307_s15 + $0x70] sm:$0xff] %v1114_v5  ;;  %v1117_v10 = vadd.f32 %v1580_v9, %v2301_v46  ;;  %v1108_v11 = vpop.f32.mrb[31].mxu0 }
 0x352   : > { %1196 = vst [vmem:[%s2307_s15 + $0x60] sm:$0xff] %v1106_v8  ;;  %v1109_v12 = vadd.f32 %v2301_v46, %v1108_v11 }
 0x353   : > { %1199 = vst [vmem:[%s2307_s15 + $0x78] sm:$0xff] %v1117_v10 }
 0x354   : > { %1197 = vst [vmem:[%s2307_s15 + $0x68] sm:$0xff] %v1109_v12 }
 0x356   : > { %v1583_v13 = vpop.f32.mrb[32].mxu0 }
 0x357   : > { %v1130_v14 = vadd.f32 %v1583_v13, %v2301_v46  ;;  %v1121_v15 = vpop.f32.mrb[33].mxu0 }
 0x358   : > { %v1122_v16 = vadd.f32 %v2301_v46, %v1121_v15  ;;  %v1584_v17 = vpop.f32.mrb[34].mxu0 }
 0x359   : > { %1202 = vst [vmem:[%s2307_s15 + $0x90] sm:$0xff] %v1130_v14  ;;  %v1133_v18 = vadd.f32 %v1584_v17, %v2301_v46  ;;  %v1124_v19 = vpop.f32.mrb[35].mxu0 }
 0x35a   : > { %1200 = vst [vmem:[%s2307_s15 + $0x80] sm:$0xff] %v1122_v16  ;;  %v1125_v20 = vadd.f32 %v2301_v46, %v1124_v19 }
 0x35b   : > { %1203 = vst [vmem:[%s2307_s15 + $0x98] sm:$0xff] %v1133_v18 }
 0x35c   : > { %1201 = vst [vmem:[%s2307_s15 + $0x88] sm:$0xff] %v1125_v20 }
 0x35e   : > { %v1587_v21 = vpop.f32.mrb[36].mxu0 }
 0x35f   : > { %v1146_v22 = vadd.f32 %v1587_v21, %v2301_v46  ;;  %v1137_v23 = vpop.f32.mrb[37].mxu0 }
 0x360   : > { %v1138_v24 = vadd.f32 %v2301_v46, %v1137_v23  ;;  %v1588_v25 = vpop.f32.mrb[38].mxu0 }
 0x361   : > { %1206 = vst [vmem:[%s2307_s15 + $0xb0] sm:$0xff] %v1146_v22  ;;  %v1149_v26 = vadd.f32 %v1588_v25, %v2301_v46  ;;  %v1140_v27 = vpop.f32.mrb[39].mxu0 }
 0x362   : > { %1204 = vst [vmem:[%s2307_s15 + $0xa0] sm:$0xff] %v1138_v24  ;;  %v1141_v28 = vadd.f32 %v2301_v46, %v1140_v27 }
 0x363   : > { %1207 = vst [vmem:[%s2307_s15 + $0xb8] sm:$0xff] %v1149_v26 }
 0x364   : > { %1205 = vst [vmem:[%s2307_s15 + $0xa8] sm:$0xff] %v1141_v28 }
 0x366   : > { %v1591_v29 = vpop.f32.mrb[40].mxu0 }
 0x367   : > { %v1162_v30 = vadd.f32 %v1591_v29, %v2301_v46  ;;  %v1153_v31 = vpop.f32.mrb[41].mxu0 }
 0x368   : > { %v1154_v32 = vadd.f32 %v2301_v46, %v1153_v31  ;;  %v1592_v33 = vpop.f32.mrb[42].mxu0 }
 0x369   : > { %1210 = vst [vmem:[%s2307_s15 + $0xd0] sm:$0xff] %v1162_v30  ;;  %v1165_v35 = vadd.f32 %v1592_v33, %v2301_v46  ;;  %v1156_v36 = vpop.f32.mrb[43].mxu0 }
 0x36a   : > { %1208 = vst [vmem:[%s2307_s15 + $0xc0] sm:$0xff] %v1154_v32  ;;  %v1157_v38 = vadd.f32 %v2301_v46, %v1156_v36 }
 0x36b   : > { %1211 = vst [vmem:[%s2307_s15 + $0xd8] sm:$0xff] %v1165_v35 }
 0x36c   : > { %1209 = vst [vmem:[%s2307_s15 + $0xc8] sm:$0xff] %v1157_v38 }
 0x36e   : > { %v1595_v39 = vpop.f32.mrb[44].mxu0 }
 0x36f   : > { %v1178_v40 = vadd.f32 %v1595_v39, %v2301_v46  ;;  %v1169_v41 = vpop.f32.mrb[45].mxu0 }
 0x370   : > { %v1170_v42 = vadd.f32 %v2301_v46, %v1169_v41  ;;  %v1596_v43 = vpop.f32.mrb[46].mxu0 }
 0x371   : > { %1214 = vst [vmem:[%s2307_s15 + $0xf0] sm:$0xff] %v1178_v40  ;;  %v1181_v44 = vadd.f32 %v1596_v43, %v2301_v46  ;;  %v1172_v45 = vpop.f32.mrb[47].mxu0 }
 0x372   : > { %1212 = vst [vmem:[%s2307_s15 + $0xe0] sm:$0xff] %v1170_v42  ;;  %v1173_v47 = vadd.f32 %v2301_v46, %v1172_v45 }
 0x373   : > { %1215 = vst [vmem:[%s2307_s15 + $0xf8] sm:$0xff] %v1181_v44 }
 0x374   : > { %1213 = vst [vmem:[%s2307_s15 + $0xe8] sm:$0xff] %v1173_v47 }
 0x375   : > { %1847 = shalt.err (!%p1844_p4)
}
 0x376   : > { %s1848_s23 = scalar_lea.hbm %s2372_s16, 4096  ;;  %s1852_s14 = scalar_lea.hbm %s2429_s7, 8192 }
 0x377   : > { %p1849_p9 = scmp.ne.s32.totalorder %s2372_s16, %s1848_s23  ;;  %p1853_p8 = scmp.lt.u32.totalorder %s2372_s16, %s2429_s7 }
 0x378   : > { %p1854_p13 = scmp.lt.u32.totalorder %s1852_s14, %s1848_s23  ;;  %p1856_p10 = scmp.lt.u32.totalorder %s1848_s23, %s2372_s16 }
 0x379   : > { %p1850_p0 = pnand %p1849_p9, %p2115_p5 }
 0x37a   : > { %p1855_p6 = por %p1854_p13, %p1853_p8 }
 0x37b   : > { %p1851_p11 = pneg %p1850_p0 }
 0x37c   : > { %p1857_p3 = por %p1856_p10, %p1855_p6 }
 0x37e   : > { %p1858_p7 = pnand %p1857_p3, %p1851_p11 }
 0x380   : > { %1861 = shalt.err (!%p1858_p7)
}
 0x381   : > { %s1919_s8 = smov 128   ;;  %s1920_s17 = smov 8  }
 0x382   : > { %1627 = dma.vmem_to_hbm [thread:$0]  (%p2115_p5), %s2374_s12, 4096, %s2372_s16, %s1217_s28, %s1919_s8, %s1919_s8, %s1920_s17  }
 0x383 PF: > { %s2449_s13 = sld [smem:[#allocation15_spill]]  ;;  %s1245_s20 = sand.u32 1, %s1896_s24  }
 0x384   : > { %p2451_p1 = scmp.ge.s32.totalorder %s1908_s27, 2  ;;  %s1246_s30 = scalar_lea.sflag [#allocation4], %s1245_s20 }
 0x389   : > { %p2450_p12 = scmp.ne.s32.totalorder %s2449_s13, 0 }
 0x38b   : > { %p1644_p2 = pnand %p2451_p1, %p2450_p12 }
 0x38d   : > { %1891 = dma.done.wait (!%p1644_p2), %s1246_s30, 4096  }
 0x38e   : > { %1893 = vsyncadd (!%p1644_p2), %s1246_s30, 4294963200  ;;  %p22_p4 = scmp.ge.s32.totalorder %s2101_s22, 4   ;;  %s2452_s24 = smov %s1900_s25 }
 0x38f   : > { %s2453_s25 = smov %s1904_s26  ;;  %s2454_s26 = smov %s2111_s18 }
 0x390   : > { %s2455_s27 = smov %s2101_s22  ;;  %24 = sbr.rel (!%p22_p4) target bundleno = 7 (0x7), region = 105 }
 0x397   :  { %1251 = vsyncpa [#allocation3], 1 }
 0x398   :  { %1253 = vsyncpa [#allocation3 + $0x1], 1 }
 0x399   :  { %1254 = vsyncpa [#allocation6], 1 }
 0x39a   :  { %1255 = vsyncpa [#allocation9], 1 }
 0x39b   :  { %1256 = vsyncpa [#allocation4], 1 }
 0x39c   :  { %1258 = vsyncpa [#allocation4 + $0x1], 1 }

</bundles_post_ra>
